<compile_context>
chip_gen: v5e
topology: v5e:2x2
jax: 0.10.0
libtpu: 0.0.40
codegen_flags: <defaults>
</compile_context>

<pallas_src>
import functools

import jax
import jax.numpy as jnp
from jax.experimental import pallas as pl
from jax.experimental.pallas import tpu as pltpu


def _gatv2_layer(x_bf, adj_f32, mask_add, w_ref, b_src_ref, b_sum_ref,
                 attn_ref, num_heads, d_out, negative_slope):
    """One GATv2Conv layer. x_bf: (N, F) bf16. Returns per-head (N, D) f32."""
    hd = num_heads * d_out

    # Fused src/dst projection: a single (N, 2*H*D) MXU matmul, f32 accumulate.
    proj = jnp.dot(x_bf, w_ref[...], preferred_element_type=jnp.float32)
    fs_nob = proj[:, :hd]                    # src feats (no bias) -> scores
    fs_b = fs_nob + b_src_ref[...]           # src feats + bsrc   -> aggregation
    fd_bb = proj[:, hd:] + b_sum_ref[...]    # dst feats + (bsrc + bdst) folded

    # One small XLU transpose replaces the old third projection matmul:
    # fs_t puts the src-node axis on lanes for lane-dense (N_dst, N_src) scores.
    fs_t = jnp.transpose(fs_nob, (1, 0))     # (H*D, N) f32

    head_outs = []
    for h in range(num_heads):
        lo = h * d_out
        # s[v,u] = sum_d a[d] * leaky_relu(fd[v,d] + fs[u,d]) as D unrolled
        # rank-1 updates: every op is (N_dst, N_src) with N_src on lanes and
        # the reduction folded into the accumulation (no XLU D-reduce).
        s = None
        for d in range(d_out):
            idx = lo + d
            z = fd_bb[:, idx:idx + 1] + fs_t[idx:idx + 1, :]   # (N, N)
            z = jnp.maximum(z, negative_slope * z)             # leaky_relu
            term = attn_ref[h, d] * z                          # SMEM scalar
            s = term if s is None else s + term

        # Masked edge-softmax over source nodes (lanes); mask tensors reused.
        s = s + mask_add
        m = jnp.max(s, axis=-1, keepdims=True)
        p = jnp.exp(s - m) * adj_f32
        denom = jnp.sum(p, axis=-1, keepdims=True)
        # Guard zero in-degree rows (denom == 0): output becomes 0, not NaN.
        rinv = pl.reciprocal(jnp.maximum(denom, jnp.float32(1e-30)), approx=True)

        # Aggregate with UNNORMALISED p on the MXU, normalise afterwards (N x D).
        agg = jnp.dot(p.astype(jnp.bfloat16),
                      fs_b[:, lo:lo + d_out].astype(jnp.bfloat16),
                      preferred_element_type=jnp.float32)
        head_outs.append(agg * rinv)
    return head_outs


def gatv2_fused_kernel(x_ref, adj_ref,
                       w1_ref, b1s_ref, b1sum_ref, a1_ref,
                       w2_ref, b2s_ref, b2sum_ref, a2_ref,
                       o_ref, *, num_heads, d1, num_classes, negative_slope):
    xb = x_ref[...].astype(jnp.bfloat16)                 # bf16 MXU operand

    # Mask material built ONCE and reused by every head of both layers.
    adj_i = adj_ref[...].astype(jnp.int32)               # single int8 widen
    mask = adj_i > 0
    mask_add = jnp.where(mask, 0.0, -1e30).astype(jnp.float32)
    adj_f32 = adj_i.astype(jnp.float32)

    # ---- layer 1: num_heads heads, d1 features per head ----
    h_heads = _gatv2_layer(xb, adj_f32, mask_add, w1_ref, b1s_ref, b1sum_ref,
                           a1_ref, num_heads, d1, negative_slope)

    # flatten(1,-1): concat head blocks along lanes -> single (N, H*d1) operand.
    h = h_heads[0] if num_heads == 1 else jnp.concatenate(h_heads, axis=-1)
    # Fused ELU with a clamped exp argument (no inf intermediates).
    h = jnp.where(h > 0, h, jnp.exp(jnp.minimum(h, 0.0)) - 1.0)
    h = h.astype(jnp.bfloat16)

    # ---- layer 2: single head, num_classes outputs, unblocked weights ----
    out = _gatv2_layer(h, adj_f32, mask_add, w2_ref, b2s_ref, b2sum_ref,
                       a2_ref, 1, num_classes, negative_slope)[0]
    o_ref[...] = out.astype(o_ref.dtype)


def gatv2_forward(params, adj, x):
    n = x.shape[0]
    num_heads, d1 = params["a1"].shape
    num_classes = params["a2"].shape[1]

    kernel = functools.partial(
        gatv2_fused_kernel, num_heads=num_heads, d1=d1,
        num_classes=num_classes, negative_slope=0.2)

    def vmem():
        return pl.BlockSpec(memory_space=pltpu.MemorySpace.VMEM)

    def smem():
        return pl.BlockSpec(memory_space=pltpu.MemorySpace.SMEM)

    return pl.pallas_call(
        kernel,
        out_shape=jax.ShapeDtypeStruct((n, num_classes), jnp.float32),
        in_specs=[vmem(), vmem(),                           # x, adj
                  vmem(), vmem(), vmem(), smem(),           # layer 1
                  vmem(), vmem(), vmem(), smem()],          # layer 2
        out_specs=vmem(),
    )(x, adj,
      params["w1"], params["b1s"], params["b1sum"], params["a1"],
      params["w2"], params["b2s"], params["b2sum"], params["a2"])


def init_gatv2_params(key, num_features, num_classes, num_heads, d1=8):
    """Synthetic GATv2Conv parameters, pre-packed for the fused kernel.

    Per layer, src/dst projection weights are fused into one bf16 matrix
    W = concat([Wsrc, Wdst], axis=-1), biases are kept as bsrc and (bsrc+bdst)
    (the sum is what the score path sees), and attention vectors are stored
    2-D (heads, d) for scalar SMEM consumption.
    """
    def lin(k, fan_in, fan_out):
        s = (2.0 / (fan_in + fan_out)) ** 0.5
        return jax.random.normal(k, (fan_in, fan_out), jnp.float32) * s

    ks = jax.random.split(key, 10)
    f2 = d1 * num_heads

    w1s = lin(ks[0], num_features, num_heads * d1)            # (F, H*d1)
    w1d = lin(ks[1], num_features, num_heads * d1)
    a1 = (jax.random.normal(ks[2], (num_heads, d1), jnp.float32)
          * (2.0 / (1 + d1)) ** 0.5)
    b1s = jax.random.normal(ks[3], (1, num_heads * d1), jnp.float32) * 0.1
    b1d = jax.random.normal(ks[4], (1, num_heads * d1), jnp.float32) * 0.1

    w2s = lin(ks[5], f2, num_classes)                         # (H*d1, C)
    w2d = lin(ks[6], f2, num_classes)
    a2 = (jax.random.normal(ks[7], (1, num_classes), jnp.float32)
          * (2.0 / (1 + num_classes)) ** 0.5)
    b2s = jax.random.normal(ks[8], (1, num_classes), jnp.float32) * 0.1
    b2d = jax.random.normal(ks[9], (1, num_classes), jnp.float32) * 0.1

    return {
        "w1": jnp.concatenate([w1s, w1d], axis=-1).astype(jnp.bfloat16),  # (F, 2*H*d1)
        "b1s": b1s, "b1sum": b1s + b1d, "a1": a1,
        "w2": jnp.concatenate([w2s, w2d], axis=-1).astype(jnp.bfloat16),  # (H*d1, 2*C)
        "b2s": b2s, "b2sum": b2s + b2d, "a2": a2,
    }


def build_adjacency(n_nodes):
    """Ring + a few chords, reverse edges added (cf. dgl.add_reverse_edges). int8 mask."""
    edges = [(i, (i + 1) % n_nodes) for i in range(n_nodes)]
    edges += [(0, 5), (3, 9), (7, 12), (2, 14)]
    edges += [(v, u) for (u, v) in edges]
    a = [[0] * n_nodes for _ in range(n_nodes)]
    for (u, v) in edges:
        a[v][u] = 1                                           # adj[dst, src]
    return jnp.array(a, dtype=jnp.int8)


# ---------------- pure-JAX reference (same packed params) ----------------
def _ref_layer(xf, ws, wd, bs, bd, a, mask, num_heads, d_out, ns=0.2):
    fs = xf @ ws + bs
    fd = xf @ wd + bd
    outs = []
    for h in range(num_heads):
        sl = slice(h * d_out, (h + 1) * d_out)
        z = fd[:, None, sl] + fs[None, :, sl]
        z = jnp.where(z > 0, z, ns * z)
        s = jnp.sum(z * a[h][None, None, :], axis=-1)
        s = jnp.where(mask, s, -1e30)
        p = jnp.where(mask, jnp.exp(s - s.max(-1, keepdims=True)), 0.0)
        alpha = p / jnp.maximum(p.sum(-1, keepdims=True), 1e-30)
        outs.append(alpha @ fs[:, sl])
    return jnp.concatenate(outs, axis=-1)


def gatv2_reference(params, adj, x, ns=0.2):
    mask = adj > 0
    num_heads, d1 = params["a1"].shape
    num_classes = params["a2"].shape[1]
    hd = num_heads * d1

    w1 = params["w1"].astype(jnp.float32)
    h = _ref_layer(x, w1[:, :hd], w1[:, hd:], params["b1s"],
                   params["b1sum"] - params["b1s"], params["a1"],
                   mask, num_heads, d1, ns)
    h = jnp.where(h > 0, h, jnp.exp(jnp.minimum(h, 0.0)) - 1.0)

    w2 = params["w2"].astype(jnp.float32)
    return _ref_layer(h, w2[:, :num_classes], w2[:, num_classes:], params["b2s"],
                      params["b2sum"] - params["b2s"], params["a2"],
                      mask, 1, num_classes, ns)


if __name__ == "__main__":
    N = 16
    NUM_FEATURES = 16
    NUM_CLASSES = 4
    NUM_HEADS = 2

    key = jax.random.PRNGKey(0)
    k_x, k_p = jax.random.split(key)
    x = jax.random.normal(k_x, (N, NUM_FEATURES), jnp.float32)
    adj = build_adjacency(N)
    params = init_gatv2_params(k_p, NUM_FEATURES, NUM_CLASSES, NUM_HEADS)

    out = jax.jit(gatv2_forward)(params, adj, x)
    out = jax.block_until_ready(out)

    assert out.shape == (N, NUM_CLASSES), out.shape
    assert bool(jnp.all(jnp.isfinite(out)))
    # Check against a pure-JAX f32 reference. Tolerance reflects the intentional
    # bf16 MXU operands (incl. unnormalised softmax weights) + approx reciprocal
    # (~1e-2 expected), tightened from the previous 0.25.
    ref = gatv2_reference(params, adj, x)
    err = float(jnp.max(jnp.abs(out - ref)))
    assert err < 5e-2, f"mismatch vs reference: max abs err {err}"
    print("KERNEL_OK")
</pallas_src>

<mosaic_0001>
module attributes {stable_mosaic.version = 11 : i64} {
  func.func @gatv2_fused_kernel(%arg0: memref<16x16xf32, #tpu.memory_space<vmem>>, %arg1: memref<16x16xi8, #tpu.memory_space<vmem>>, %arg2: memref<16x32xbf16, #tpu.memory_space<vmem>>, %arg3: memref<1x16xf32, #tpu.memory_space<vmem>>, %arg4: memref<1x16xf32, #tpu.memory_space<vmem>>, %arg5: memref<2x8xf32, #tpu.memory_space<smem>>, %arg6: memref<16x8xbf16, #tpu.memory_space<vmem>>, %arg7: memref<1x4xf32, #tpu.memory_space<vmem>>, %arg8: memref<1x4xf32, #tpu.memory_space<vmem>>, %arg9: memref<1x4xf32, #tpu.memory_space<smem>>, %arg10: memref<16x4xf32, #tpu.memory_space<vmem>>) attributes {dimension_semantics = [], scalar_prefetch = 0 : i64, scratch_operands = 0 : i64, tpu.core_type = #tpu.core_type<tc>} {
    %c0 = arith.constant 0 : index
    %c0_0 = arith.constant 0 : index
    %0 = vector.load %arg0[%c0, %c0_0] : memref<16x16xf32, #tpu.memory_space<vmem>>, vector<16x16xf32>
    %1 = arith.truncf %0 : vector<16x16xf32> to vector<16x16xbf16>
    %c0_1 = arith.constant 0 : index
    %c0_2 = arith.constant 0 : index
    %2 = vector.load %arg1[%c0_1, %c0_2] : memref<16x16xi8, #tpu.memory_space<vmem>>, vector<16x16xi8>
    %3 = arith.extsi %2 : vector<16x16xi8> to vector<16x16xi32>
    %c0_i32 = arith.constant 0 : i32
    %4 = vector.broadcast %c0_i32 : i32 to vector<16x16xi32>
    %5 = arith.cmpi sgt, %3, %4 : vector<16x16xi32>
    %cst = arith.constant 0.000000e+00 : f32
    %cst_3 = arith.constant -1.000000e+30 : f32
    %6 = vector.broadcast %cst : f32 to vector<16x16xf32>
    %7 = vector.broadcast %cst_3 : f32 to vector<16x16xf32>
    %8 = arith.select %5, %6, %7 : vector<16x16xi1>, vector<16x16xf32>
    %9 = arith.sitofp %3 : vector<16x16xi32> to vector<16x16xf32>
    %c0_4 = arith.constant 0 : index
    %c0_5 = arith.constant 0 : index
    %10 = vector.load %arg2[%c0_4, %c0_5] : memref<16x32xbf16, #tpu.memory_space<vmem>>, vector<16x32xbf16>
    %cst_6 = arith.constant dense<0.000000e+00> : vector<16x32xf32>
    %11 = tpu.matmul %1, %10, %cst_6 {dimension_numbers = #tpu.dot_dimension_numbers<[1], [0], [0], [1], [0, 0, 1, 1], [], []>} : vector<16x16xbf16>, vector<16x32xbf16>, vector<16x32xf32> -> vector<16x32xf32>
    %12 = vector.extract_strided_slice %11 {offsets = [0, 0], sizes = [16, 16], strides = [1, 1]} : vector<16x32xf32> to vector<16x16xf32>
    %c0_7 = arith.constant 0 : index
    %c0_8 = arith.constant 0 : index
    %13 = vector.load %arg3[%c0_7, %c0_8] : memref<1x16xf32, #tpu.memory_space<vmem>>, vector<1x16xf32>
    %14 = vector.broadcast %13 : vector<1x16xf32> to vector<16x16xf32>
    %15 = arith.addf %12, %14 : vector<16x16xf32>
    %16 = vector.extract_strided_slice %11 {offsets = [0, 16], sizes = [16, 16], strides = [1, 1]} : vector<16x32xf32> to vector<16x16xf32>
    %c0_9 = arith.constant 0 : index
    %c0_10 = arith.constant 0 : index
    %17 = vector.load %arg4[%c0_9, %c0_10] : memref<1x16xf32, #tpu.memory_space<vmem>>, vector<1x16xf32>
    %18 = vector.broadcast %17 : vector<1x16xf32> to vector<16x16xf32>
    %19 = arith.addf %16, %18 : vector<16x16xf32>
    %20 = tpu.transpose %12, [1, 0] : vector<16x16xf32> -> vector<16x16xf32>
    %21 = vector.extract_strided_slice %19 {offsets = [0, 0], sizes = [16, 1], strides = [1, 1]} : vector<16x16xf32> to vector<16x1xf32>
    %22 = vector.extract_strided_slice %20 {offsets = [0, 0], sizes = [1, 16], strides = [1, 1]} : vector<16x16xf32> to vector<1x16xf32>
    %23 = vector.broadcast %21 : vector<16x1xf32> to vector<16x16xf32>
    %24 = vector.broadcast %22 : vector<1x16xf32> to vector<16x16xf32>
    %25 = arith.addf %23, %24 : vector<16x16xf32>
    %cst_11 = arith.constant 2.000000e-01 : f32
    %26 = vector.broadcast %cst_11 : f32 to vector<16x16xf32>
    %27 = arith.mulf %26, %25 : vector<16x16xf32>
    %28 = arith.maximumf %25, %27 : vector<16x16xf32>
    %c0_12 = arith.constant 0 : index
    %c0_13 = arith.constant 0 : index
    %29 = memref.load %arg5[%c0_12, %c0_13] : memref<2x8xf32, #tpu.memory_space<smem>>
    %30 = vector.broadcast %29 : f32 to vector<16x16xf32>
    %31 = arith.mulf %30, %28 : vector<16x16xf32>
    %32 = vector.extract_strided_slice %19 {offsets = [0, 1], sizes = [16, 1], strides = [1, 1]} : vector<16x16xf32> to vector<16x1xf32>
    %33 = vector.extract_strided_slice %20 {offsets = [1, 0], sizes = [1, 16], strides = [1, 1]} : vector<16x16xf32> to vector<1x16xf32>
    %34 = vector.broadcast %32 : vector<16x1xf32> to vector<16x16xf32>
    %35 = vector.broadcast %33 : vector<1x16xf32> to vector<16x16xf32>
    %36 = arith.addf %34, %35 : vector<16x16xf32>
    %cst_14 = arith.constant 2.000000e-01 : f32
    %37 = vector.broadcast %cst_14 : f32 to vector<16x16xf32>
    %38 = arith.mulf %37, %36 : vector<16x16xf32>
    %39 = arith.maximumf %36, %38 : vector<16x16xf32>
    %c0_15 = arith.constant 0 : index
    %c1 = arith.constant 1 : index
    %40 = memref.load %arg5[%c0_15, %c1] : memref<2x8xf32, #tpu.memory_space<smem>>
    %41 = vector.broadcast %40 : f32 to vector<16x16xf32>
    %42 = arith.mulf %41, %39 : vector<16x16xf32>
    %43 = arith.addf %31, %42 : vector<16x16xf32>
    %44 = vector.extract_strided_slice %19 {offsets = [0, 2], sizes = [16, 1], strides = [1, 1]} : vector<16x16xf32> to vector<16x1xf32>
    %45 = vector.extract_strided_slice %20 {offsets = [2, 0], sizes = [1, 16], strides = [1, 1]} : vector<16x16xf32> to vector<1x16xf32>
    %46 = vector.broadcast %44 : vector<16x1xf32> to vector<16x16xf32>
    %47 = vector.broadcast %45 : vector<1x16xf32> to vector<16x16xf32>
    %48 = arith.addf %46, %47 : vector<16x16xf32>
    %cst_16 = arith.constant 2.000000e-01 : f32
    %49 = vector.broadcast %cst_16 : f32 to vector<16x16xf32>
    %50 = arith.mulf %49, %48 : vector<16x16xf32>
    %51 = arith.maximumf %48, %50 : vector<16x16xf32>
    %c0_17 = arith.constant 0 : index
    %c2 = arith.constant 2 : index
    %52 = memref.load %arg5[%c0_17, %c2] : memref<2x8xf32, #tpu.memory_space<smem>>
    %53 = vector.broadcast %52 : f32 to vector<16x16xf32>
    %54 = arith.mulf %53, %51 : vector<16x16xf32>
    %55 = arith.addf %43, %54 : vector<16x16xf32>
    %56 = vector.extract_strided_slice %19 {offsets = [0, 3], sizes = [16, 1], strides = [1, 1]} : vector<16x16xf32> to vector<16x1xf32>
    %57 = vector.extract_strided_slice %20 {offsets = [3, 0], sizes = [1, 16], strides = [1, 1]} : vector<16x16xf32> to vector<1x16xf32>
    %58 = vector.broadcast %56 : vector<16x1xf32> to vector<16x16xf32>
    %59 = vector.broadcast %57 : vector<1x16xf32> to vector<16x16xf32>
    %60 = arith.addf %58, %59 : vector<16x16xf32>
    %cst_18 = arith.constant 2.000000e-01 : f32
    %61 = vector.broadcast %cst_18 : f32 to vector<16x16xf32>
    %62 = arith.mulf %61, %60 : vector<16x16xf32>
    %63 = arith.maximumf %60, %62 : vector<16x16xf32>
    %c0_19 = arith.constant 0 : index
    %c3 = arith.constant 3 : index
    %64 = memref.load %arg5[%c0_19, %c3] : memref<2x8xf32, #tpu.memory_space<smem>>
    %65 = vector.broadcast %64 : f32 to vector<16x16xf32>
    %66 = arith.mulf %65, %63 : vector<16x16xf32>
    %67 = arith.addf %55, %66 : vector<16x16xf32>
    %68 = vector.extract_strided_slice %19 {offsets = [0, 4], sizes = [16, 1], strides = [1, 1]} : vector<16x16xf32> to vector<16x1xf32>
    %69 = vector.extract_strided_slice %20 {offsets = [4, 0], sizes = [1, 16], strides = [1, 1]} : vector<16x16xf32> to vector<1x16xf32>
    %70 = vector.broadcast %68 : vector<16x1xf32> to vector<16x16xf32>
    %71 = vector.broadcast %69 : vector<1x16xf32> to vector<16x16xf32>
    %72 = arith.addf %70, %71 : vector<16x16xf32>
    %cst_20 = arith.constant 2.000000e-01 : f32
    %73 = vector.broadcast %cst_20 : f32 to vector<16x16xf32>
    %74 = arith.mulf %73, %72 : vector<16x16xf32>
    %75 = arith.maximumf %72, %74 : vector<16x16xf32>
    %c0_21 = arith.constant 0 : index
    %c4 = arith.constant 4 : index
    %76 = memref.load %arg5[%c0_21, %c4] : memref<2x8xf32, #tpu.memory_space<smem>>
    %77 = vector.broadcast %76 : f32 to vector<16x16xf32>
    %78 = arith.mulf %77, %75 : vector<16x16xf32>
    %79 = arith.addf %67, %78 : vector<16x16xf32>
    %80 = vector.extract_strided_slice %19 {offsets = [0, 5], sizes = [16, 1], strides = [1, 1]} : vector<16x16xf32> to vector<16x1xf32>
    %81 = vector.extract_strided_slice %20 {offsets = [5, 0], sizes = [1, 16], strides = [1, 1]} : vector<16x16xf32> to vector<1x16xf32>
    %82 = vector.broadcast %80 : vector<16x1xf32> to vector<16x16xf32>
    %83 = vector.broadcast %81 : vector<1x16xf32> to vector<16x16xf32>
    %84 = arith.addf %82, %83 : vector<16x16xf32>
    %cst_22 = arith.constant 2.000000e-01 : f32
    %85 = vector.broadcast %cst_22 : f32 to vector<16x16xf32>
    %86 = arith.mulf %85, %84 : vector<16x16xf32>
    %87 = arith.maximumf %84, %86 : vector<16x16xf32>
    %c0_23 = arith.constant 0 : index
    %c5 = arith.constant 5 : index
    %88 = memref.load %arg5[%c0_23, %c5] : memref<2x8xf32, #tpu.memory_space<smem>>
    %89 = vector.broadcast %88 : f32 to vector<16x16xf32>
    %90 = arith.mulf %89, %87 : vector<16x16xf32>
    %91 = arith.addf %79, %90 : vector<16x16xf32>
    %92 = vector.extract_strided_slice %19 {offsets = [0, 6], sizes = [16, 1], strides = [1, 1]} : vector<16x16xf32> to vector<16x1xf32>
    %93 = vector.extract_strided_slice %20 {offsets = [6, 0], sizes = [1, 16], strides = [1, 1]} : vector<16x16xf32> to vector<1x16xf32>
    %94 = vector.broadcast %92 : vector<16x1xf32> to vector<16x16xf32>
    %95 = vector.broadcast %93 : vector<1x16xf32> to vector<16x16xf32>
    %96 = arith.addf %94, %95 : vector<16x16xf32>
    %cst_24 = arith.constant 2.000000e-01 : f32
    %97 = vector.broadcast %cst_24 : f32 to vector<16x16xf32>
    %98 = arith.mulf %97, %96 : vector<16x16xf32>
    %99 = arith.maximumf %96, %98 : vector<16x16xf32>
    %c0_25 = arith.constant 0 : index
    %c6 = arith.constant 6 : index
    %100 = memref.load %arg5[%c0_25, %c6] : memref<2x8xf32, #tpu.memory_space<smem>>
    %101 = vector.broadcast %100 : f32 to vector<16x16xf32>
    %102 = arith.mulf %101, %99 : vector<16x16xf32>
    %103 = arith.addf %91, %102 : vector<16x16xf32>
    %104 = vector.extract_strided_slice %19 {offsets = [0, 7], sizes = [16, 1], strides = [1, 1]} : vector<16x16xf32> to vector<16x1xf32>
    %105 = vector.extract_strided_slice %20 {offsets = [7, 0], sizes = [1, 16], strides = [1, 1]} : vector<16x16xf32> to vector<1x16xf32>
    %106 = vector.broadcast %104 : vector<16x1xf32> to vector<16x16xf32>
    %107 = vector.broadcast %105 : vector<1x16xf32> to vector<16x16xf32>
    %108 = arith.addf %106, %107 : vector<16x16xf32>
    %cst_26 = arith.constant 2.000000e-01 : f32
    %109 = vector.broadcast %cst_26 : f32 to vector<16x16xf32>
    %110 = arith.mulf %109, %108 : vector<16x16xf32>
    %111 = arith.maximumf %108, %110 : vector<16x16xf32>
    %c0_27 = arith.constant 0 : index
    %c7 = arith.constant 7 : index
    %112 = memref.load %arg5[%c0_27, %c7] : memref<2x8xf32, #tpu.memory_space<smem>>
    %113 = vector.broadcast %112 : f32 to vector<16x16xf32>
    %114 = arith.mulf %113, %111 : vector<16x16xf32>
    %115 = arith.addf %103, %114 : vector<16x16xf32>
    %116 = arith.addf %115, %8 : vector<16x16xf32>
    %cst_28 = arith.constant dense<0xFF800000> : vector<16xf32>
    %117 = vector.multi_reduction <maximumf>, %116, %cst_28 [1] : vector<16x16xf32> to vector<16xf32>
    %118 = vector.shape_cast %117 : vector<16xf32> to vector<16x1xf32>
    %119 = vector.broadcast %118 : vector<16x1xf32> to vector<16x16xf32>
    %120 = arith.subf %116, %119 : vector<16x16xf32>
    %121 = math.exp %120 : vector<16x16xf32>
    %122 = arith.mulf %121, %9 : vector<16x16xf32>
    %cst_29 = arith.constant dense<0.000000e+00> : vector<16xf32>
    %123 = vector.multi_reduction <add>, %122, %cst_29 [1] : vector<16x16xf32> to vector<16xf32>
    %124 = vector.shape_cast %123 : vector<16xf32> to vector<16x1xf32>
    %cst_30 = arith.constant 1.000000e-30 : f32
    %125 = vector.broadcast %cst_30 : f32 to vector<16x1xf32>
    %126 = arith.maximumf %124, %125 : vector<16x1xf32>
    %127 = tpu.reciprocal %126 {approx = true} : vector<16x1xf32> -> vector<16x1xf32>
    %128 = arith.truncf %122 : vector<16x16xf32> to vector<16x16xbf16>
    %129 = vector.extract_strided_slice %15 {offsets = [0, 0], sizes = [16, 8], strides = [1, 1]} : vector<16x16xf32> to vector<16x8xf32>
    %130 = arith.truncf %129 : vector<16x8xf32> to vector<16x8xbf16>
    %cst_31 = arith.constant dense<0.000000e+00> : vector<16x8xf32>
    %131 = tpu.matmul %128, %130, %cst_31 {dimension_numbers = #tpu.dot_dimension_numbers<[1], [0], [0], [1], [0, 0, 1, 1], [], []>} : vector<16x16xbf16>, vector<16x8xbf16>, vector<16x8xf32> -> vector<16x8xf32>
    %132 = vector.broadcast %127 : vector<16x1xf32> to vector<16x8xf32>
    %133 = arith.mulf %131, %132 : vector<16x8xf32>
    %134 = vector.extract_strided_slice %19 {offsets = [0, 8], sizes = [16, 1], strides = [1, 1]} : vector<16x16xf32> to vector<16x1xf32>
    %135 = vector.extract_strided_slice %20 {offsets = [8, 0], sizes = [1, 16], strides = [1, 1]} : vector<16x16xf32> to vector<1x16xf32>
    %136 = vector.broadcast %134 : vector<16x1xf32> to vector<16x16xf32>
    %137 = vector.broadcast %135 : vector<1x16xf32> to vector<16x16xf32>
    %138 = arith.addf %136, %137 : vector<16x16xf32>
    %cst_32 = arith.constant 2.000000e-01 : f32
    %139 = vector.broadcast %cst_32 : f32 to vector<16x16xf32>
    %140 = arith.mulf %139, %138 : vector<16x16xf32>
    %141 = arith.maximumf %138, %140 : vector<16x16xf32>
    %c1_33 = arith.constant 1 : index
    %c0_34 = arith.constant 0 : index
    %142 = memref.load %arg5[%c1_33, %c0_34] : memref<2x8xf32, #tpu.memory_space<smem>>
    %143 = vector.broadcast %142 : f32 to vector<16x16xf32>
    %144 = arith.mulf %143, %141 : vector<16x16xf32>
    %145 = vector.extract_strided_slice %19 {offsets = [0, 9], sizes = [16, 1], strides = [1, 1]} : vector<16x16xf32> to vector<16x1xf32>
    %146 = vector.extract_strided_slice %20 {offsets = [9, 0], sizes = [1, 16], strides = [1, 1]} : vector<16x16xf32> to vector<1x16xf32>
    %147 = vector.broadcast %145 : vector<16x1xf32> to vector<16x16xf32>
    %148 = vector.broadcast %146 : vector<1x16xf32> to vector<16x16xf32>
    %149 = arith.addf %147, %148 : vector<16x16xf32>
    %cst_35 = arith.constant 2.000000e-01 : f32
    %150 = vector.broadcast %cst_35 : f32 to vector<16x16xf32>
    %151 = arith.mulf %150, %149 : vector<16x16xf32>
    %152 = arith.maximumf %149, %151 : vector<16x16xf32>
    %c1_36 = arith.constant 1 : index
    %c1_37 = arith.constant 1 : index
    %153 = memref.load %arg5[%c1_36, %c1_37] : memref<2x8xf32, #tpu.memory_space<smem>>
    %154 = vector.broadcast %153 : f32 to vector<16x16xf32>
    %155 = arith.mulf %154, %152 : vector<16x16xf32>
    %156 = arith.addf %144, %155 : vector<16x16xf32>
    %157 = vector.extract_strided_slice %19 {offsets = [0, 10], sizes = [16, 1], strides = [1, 1]} : vector<16x16xf32> to vector<16x1xf32>
    %158 = vector.extract_strided_slice %20 {offsets = [10, 0], sizes = [1, 16], strides = [1, 1]} : vector<16x16xf32> to vector<1x16xf32>
    %159 = vector.broadcast %157 : vector<16x1xf32> to vector<16x16xf32>
    %160 = vector.broadcast %158 : vector<1x16xf32> to vector<16x16xf32>
    %161 = arith.addf %159, %160 : vector<16x16xf32>
    %cst_38 = arith.constant 2.000000e-01 : f32
    %162 = vector.broadcast %cst_38 : f32 to vector<16x16xf32>
    %163 = arith.mulf %162, %161 : vector<16x16xf32>
    %164 = arith.maximumf %161, %163 : vector<16x16xf32>
    %c1_39 = arith.constant 1 : index
    %c2_40 = arith.constant 2 : index
    %165 = memref.load %arg5[%c1_39, %c2_40] : memref<2x8xf32, #tpu.memory_space<smem>>
    %166 = vector.broadcast %165 : f32 to vector<16x16xf32>
    %167 = arith.mulf %166, %164 : vector<16x16xf32>
    %168 = arith.addf %156, %167 : vector<16x16xf32>
    %169 = vector.extract_strided_slice %19 {offsets = [0, 11], sizes = [16, 1], strides = [1, 1]} : vector<16x16xf32> to vector<16x1xf32>
    %170 = vector.extract_strided_slice %20 {offsets = [11, 0], sizes = [1, 16], strides = [1, 1]} : vector<16x16xf32> to vector<1x16xf32>
    %171 = vector.broadcast %169 : vector<16x1xf32> to vector<16x16xf32>
    %172 = vector.broadcast %170 : vector<1x16xf32> to vector<16x16xf32>
    %173 = arith.addf %171, %172 : vector<16x16xf32>
    %cst_41 = arith.constant 2.000000e-01 : f32
    %174 = vector.broadcast %cst_41 : f32 to vector<16x16xf32>
    %175 = arith.mulf %174, %173 : vector<16x16xf32>
    %176 = arith.maximumf %173, %175 : vector<16x16xf32>
    %c1_42 = arith.constant 1 : index
    %c3_43 = arith.constant 3 : index
    %177 = memref.load %arg5[%c1_42, %c3_43] : memref<2x8xf32, #tpu.memory_space<smem>>
    %178 = vector.broadcast %177 : f32 to vector<16x16xf32>
    %179 = arith.mulf %178, %176 : vector<16x16xf32>
    %180 = arith.addf %168, %179 : vector<16x16xf32>
    %181 = vector.extract_strided_slice %19 {offsets = [0, 12], sizes = [16, 1], strides = [1, 1]} : vector<16x16xf32> to vector<16x1xf32>
    %182 = vector.extract_strided_slice %20 {offsets = [12, 0], sizes = [1, 16], strides = [1, 1]} : vector<16x16xf32> to vector<1x16xf32>
    %183 = vector.broadcast %181 : vector<16x1xf32> to vector<16x16xf32>
    %184 = vector.broadcast %182 : vector<1x16xf32> to vector<16x16xf32>
    %185 = arith.addf %183, %184 : vector<16x16xf32>
    %cst_44 = arith.constant 2.000000e-01 : f32
    %186 = vector.broadcast %cst_44 : f32 to vector<16x16xf32>
    %187 = arith.mulf %186, %185 : vector<16x16xf32>
    %188 = arith.maximumf %185, %187 : vector<16x16xf32>
    %c1_45 = arith.constant 1 : index
    %c4_46 = arith.constant 4 : index
    %189 = memref.load %arg5[%c1_45, %c4_46] : memref<2x8xf32, #tpu.memory_space<smem>>
    %190 = vector.broadcast %189 : f32 to vector<16x16xf32>
    %191 = arith.mulf %190, %188 : vector<16x16xf32>
    %192 = arith.addf %180, %191 : vector<16x16xf32>
    %193 = vector.extract_strided_slice %19 {offsets = [0, 13], sizes = [16, 1], strides = [1, 1]} : vector<16x16xf32> to vector<16x1xf32>
    %194 = vector.extract_strided_slice %20 {offsets = [13, 0], sizes = [1, 16], strides = [1, 1]} : vector<16x16xf32> to vector<1x16xf32>
    %195 = vector.broadcast %193 : vector<16x1xf32> to vector<16x16xf32>
    %196 = vector.broadcast %194 : vector<1x16xf32> to vector<16x16xf32>
    %197 = arith.addf %195, %196 : vector<16x16xf32>
    %cst_47 = arith.constant 2.000000e-01 : f32
    %198 = vector.broadcast %cst_47 : f32 to vector<16x16xf32>
    %199 = arith.mulf %198, %197 : vector<16x16xf32>
    %200 = arith.maximumf %197, %199 : vector<16x16xf32>
    %c1_48 = arith.constant 1 : index
    %c5_49 = arith.constant 5 : index
    %201 = memref.load %arg5[%c1_48, %c5_49] : memref<2x8xf32, #tpu.memory_space<smem>>
    %202 = vector.broadcast %201 : f32 to vector<16x16xf32>
    %203 = arith.mulf %202, %200 : vector<16x16xf32>
    %204 = arith.addf %192, %203 : vector<16x16xf32>
    %205 = vector.extract_strided_slice %19 {offsets = [0, 14], sizes = [16, 1], strides = [1, 1]} : vector<16x16xf32> to vector<16x1xf32>
    %206 = vector.extract_strided_slice %20 {offsets = [14, 0], sizes = [1, 16], strides = [1, 1]} : vector<16x16xf32> to vector<1x16xf32>
    %207 = vector.broadcast %205 : vector<16x1xf32> to vector<16x16xf32>
    %208 = vector.broadcast %206 : vector<1x16xf32> to vector<16x16xf32>
    %209 = arith.addf %207, %208 : vector<16x16xf32>
    %cst_50 = arith.constant 2.000000e-01 : f32
    %210 = vector.broadcast %cst_50 : f32 to vector<16x16xf32>
    %211 = arith.mulf %210, %209 : vector<16x16xf32>
    %212 = arith.maximumf %209, %211 : vector<16x16xf32>
    %c1_51 = arith.constant 1 : index
    %c6_52 = arith.constant 6 : index
    %213 = memref.load %arg5[%c1_51, %c6_52] : memref<2x8xf32, #tpu.memory_space<smem>>
    %214 = vector.broadcast %213 : f32 to vector<16x16xf32>
    %215 = arith.mulf %214, %212 : vector<16x16xf32>
    %216 = arith.addf %204, %215 : vector<16x16xf32>
    %217 = vector.extract_strided_slice %19 {offsets = [0, 15], sizes = [16, 1], strides = [1, 1]} : vector<16x16xf32> to vector<16x1xf32>
    %218 = vector.extract_strided_slice %20 {offsets = [15, 0], sizes = [1, 16], strides = [1, 1]} : vector<16x16xf32> to vector<1x16xf32>
    %219 = vector.broadcast %217 : vector<16x1xf32> to vector<16x16xf32>
    %220 = vector.broadcast %218 : vector<1x16xf32> to vector<16x16xf32>
    %221 = arith.addf %219, %220 : vector<16x16xf32>
    %cst_53 = arith.constant 2.000000e-01 : f32
    %222 = vector.broadcast %cst_53 : f32 to vector<16x16xf32>
    %223 = arith.mulf %222, %221 : vector<16x16xf32>
    %224 = arith.maximumf %221, %223 : vector<16x16xf32>
    %c1_54 = arith.constant 1 : index
    %c7_55 = arith.constant 7 : index
    %225 = memref.load %arg5[%c1_54, %c7_55] : memref<2x8xf32, #tpu.memory_space<smem>>
    %226 = vector.broadcast %225 : f32 to vector<16x16xf32>
    %227 = arith.mulf %226, %224 : vector<16x16xf32>
    %228 = arith.addf %216, %227 : vector<16x16xf32>
    %229 = arith.addf %228, %8 : vector<16x16xf32>
    %cst_56 = arith.constant dense<0xFF800000> : vector<16xf32>
    %230 = vector.multi_reduction <maximumf>, %229, %cst_56 [1] : vector<16x16xf32> to vector<16xf32>
    %231 = vector.shape_cast %230 : vector<16xf32> to vector<16x1xf32>
    %232 = vector.broadcast %231 : vector<16x1xf32> to vector<16x16xf32>
    %233 = arith.subf %229, %232 : vector<16x16xf32>
    %234 = math.exp %233 : vector<16x16xf32>
    %235 = arith.mulf %234, %9 : vector<16x16xf32>
    %cst_57 = arith.constant dense<0.000000e+00> : vector<16xf32>
    %236 = vector.multi_reduction <add>, %235, %cst_57 [1] : vector<16x16xf32> to vector<16xf32>
    %237 = vector.shape_cast %236 : vector<16xf32> to vector<16x1xf32>
    %cst_58 = arith.constant 1.000000e-30 : f32
    %238 = vector.broadcast %cst_58 : f32 to vector<16x1xf32>
    %239 = arith.maximumf %237, %238 : vector<16x1xf32>
    %240 = tpu.reciprocal %239 {approx = true} : vector<16x1xf32> -> vector<16x1xf32>
    %241 = arith.truncf %235 : vector<16x16xf32> to vector<16x16xbf16>
    %242 = vector.extract_strided_slice %15 {offsets = [0, 8], sizes = [16, 8], strides = [1, 1]} : vector<16x16xf32> to vector<16x8xf32>
    %243 = arith.truncf %242 : vector<16x8xf32> to vector<16x8xbf16>
    %cst_59 = arith.constant dense<0.000000e+00> : vector<16x8xf32>
    %244 = tpu.matmul %241, %243, %cst_59 {dimension_numbers = #tpu.dot_dimension_numbers<[1], [0], [0], [1], [0, 0, 1, 1], [], []>} : vector<16x16xbf16>, vector<16x8xbf16>, vector<16x8xf32> -> vector<16x8xf32>
    %245 = vector.broadcast %240 : vector<16x1xf32> to vector<16x8xf32>
    %246 = arith.mulf %244, %245 : vector<16x8xf32>
    %247 = tpu.concatenate %133, %246 in 1 : vector<16x8xf32>, vector<16x8xf32> -> vector<16x16xf32>
    %cst_60 = arith.constant 0.000000e+00 : f32
    %248 = vector.broadcast %cst_60 : f32 to vector<16x16xf32>
    %249 = arith.cmpf ogt, %247, %248 : vector<16x16xf32>
    %cst_61 = arith.constant 0.000000e+00 : f32
    %250 = vector.broadcast %cst_61 : f32 to vector<16x16xf32>
    %251 = arith.minimumf %247, %250 : vector<16x16xf32>
    %252 = math.exp %251 : vector<16x16xf32>
    %cst_62 = arith.constant 1.000000e+00 : f32
    %253 = vector.broadcast %cst_62 : f32 to vector<16x16xf32>
    %254 = arith.subf %252, %253 : vector<16x16xf32>
    %255 = arith.select %249, %247, %254 : vector<16x16xi1>, vector<16x16xf32>
    %256 = arith.truncf %255 : vector<16x16xf32> to vector<16x16xbf16>
    %c0_63 = arith.constant 0 : index
    %c0_64 = arith.constant 0 : index
    %257 = vector.load %arg6[%c0_63, %c0_64] : memref<16x8xbf16, #tpu.memory_space<vmem>>, vector<16x8xbf16>
    %cst_65 = arith.constant dense<0.000000e+00> : vector<16x8xf32>
    %258 = tpu.matmul %256, %257, %cst_65 {dimension_numbers = #tpu.dot_dimension_numbers<[1], [0], [0], [1], [0, 0, 1, 1], [], []>} : vector<16x16xbf16>, vector<16x8xbf16>, vector<16x8xf32> -> vector<16x8xf32>
    %259 = vector.extract_strided_slice %258 {offsets = [0, 0], sizes = [16, 4], strides = [1, 1]} : vector<16x8xf32> to vector<16x4xf32>
    %c0_66 = arith.constant 0 : index
    %c0_67 = arith.constant 0 : index
    %260 = vector.load %arg7[%c0_66, %c0_67] : memref<1x4xf32, #tpu.memory_space<vmem>>, vector<1x4xf32>
    %261 = vector.broadcast %260 : vector<1x4xf32> to vector<16x4xf32>
    %262 = arith.addf %259, %261 : vector<16x4xf32>
    %263 = vector.extract_strided_slice %258 {offsets = [0, 4], sizes = [16, 4], strides = [1, 1]} : vector<16x8xf32> to vector<16x4xf32>
    %c0_68 = arith.constant 0 : index
    %c0_69 = arith.constant 0 : index
    %264 = vector.load %arg8[%c0_68, %c0_69] : memref<1x4xf32, #tpu.memory_space<vmem>>, vector<1x4xf32>
    %265 = vector.broadcast %264 : vector<1x4xf32> to vector<16x4xf32>
    %266 = arith.addf %263, %265 : vector<16x4xf32>
    %267 = tpu.transpose %259, [1, 0] : vector<16x4xf32> -> vector<4x16xf32>
    %268 = vector.extract_strided_slice %266 {offsets = [0, 0], sizes = [16, 1], strides = [1, 1]} : vector<16x4xf32> to vector<16x1xf32>
    %269 = vector.extract_strided_slice %267 {offsets = [0, 0], sizes = [1, 16], strides = [1, 1]} : vector<4x16xf32> to vector<1x16xf32>
    %270 = vector.broadcast %268 : vector<16x1xf32> to vector<16x16xf32>
    %271 = vector.broadcast %269 : vector<1x16xf32> to vector<16x16xf32>
    %272 = arith.addf %270, %271 : vector<16x16xf32>
    %cst_70 = arith.constant 2.000000e-01 : f32
    %273 = vector.broadcast %cst_70 : f32 to vector<16x16xf32>
    %274 = arith.mulf %273, %272 : vector<16x16xf32>
    %275 = arith.maximumf %272, %274 : vector<16x16xf32>
    %c0_71 = arith.constant 0 : index
    %c0_72 = arith.constant 0 : index
    %276 = memref.load %arg9[%c0_71, %c0_72] : memref<1x4xf32, #tpu.memory_space<smem>>
    %277 = vector.broadcast %276 : f32 to vector<16x16xf32>
    %278 = arith.mulf %277, %275 : vector<16x16xf32>
    %279 = vector.extract_strided_slice %266 {offsets = [0, 1], sizes = [16, 1], strides = [1, 1]} : vector<16x4xf32> to vector<16x1xf32>
    %280 = vector.extract_strided_slice %267 {offsets = [1, 0], sizes = [1, 16], strides = [1, 1]} : vector<4x16xf32> to vector<1x16xf32>
    %281 = vector.broadcast %279 : vector<16x1xf32> to vector<16x16xf32>
    %282 = vector.broadcast %280 : vector<1x16xf32> to vector<16x16xf32>
    %283 = arith.addf %281, %282 : vector<16x16xf32>
    %cst_73 = arith.constant 2.000000e-01 : f32
    %284 = vector.broadcast %cst_73 : f32 to vector<16x16xf32>
    %285 = arith.mulf %284, %283 : vector<16x16xf32>
    %286 = arith.maximumf %283, %285 : vector<16x16xf32>
    %c0_74 = arith.constant 0 : index
    %c1_75 = arith.constant 1 : index
    %287 = memref.load %arg9[%c0_74, %c1_75] : memref<1x4xf32, #tpu.memory_space<smem>>
    %288 = vector.broadcast %287 : f32 to vector<16x16xf32>
    %289 = arith.mulf %288, %286 : vector<16x16xf32>
    %290 = arith.addf %278, %289 : vector<16x16xf32>
    %291 = vector.extract_strided_slice %266 {offsets = [0, 2], sizes = [16, 1], strides = [1, 1]} : vector<16x4xf32> to vector<16x1xf32>
    %292 = vector.extract_strided_slice %267 {offsets = [2, 0], sizes = [1, 16], strides = [1, 1]} : vector<4x16xf32> to vector<1x16xf32>
    %293 = vector.broadcast %291 : vector<16x1xf32> to vector<16x16xf32>
    %294 = vector.broadcast %292 : vector<1x16xf32> to vector<16x16xf32>
    %295 = arith.addf %293, %294 : vector<16x16xf32>
    %cst_76 = arith.constant 2.000000e-01 : f32
    %296 = vector.broadcast %cst_76 : f32 to vector<16x16xf32>
    %297 = arith.mulf %296, %295 : vector<16x16xf32>
    %298 = arith.maximumf %295, %297 : vector<16x16xf32>
    %c0_77 = arith.constant 0 : index
    %c2_78 = arith.constant 2 : index
    %299 = memref.load %arg9[%c0_77, %c2_78] : memref<1x4xf32, #tpu.memory_space<smem>>
    %300 = vector.broadcast %299 : f32 to vector<16x16xf32>
    %301 = arith.mulf %300, %298 : vector<16x16xf32>
    %302 = arith.addf %290, %301 : vector<16x16xf32>
    %303 = vector.extract_strided_slice %266 {offsets = [0, 3], sizes = [16, 1], strides = [1, 1]} : vector<16x4xf32> to vector<16x1xf32>
    %304 = vector.extract_strided_slice %267 {offsets = [3, 0], sizes = [1, 16], strides = [1, 1]} : vector<4x16xf32> to vector<1x16xf32>
    %305 = vector.broadcast %303 : vector<16x1xf32> to vector<16x16xf32>
    %306 = vector.broadcast %304 : vector<1x16xf32> to vector<16x16xf32>
    %307 = arith.addf %305, %306 : vector<16x16xf32>
    %cst_79 = arith.constant 2.000000e-01 : f32
    %308 = vector.broadcast %cst_79 : f32 to vector<16x16xf32>
    %309 = arith.mulf %308, %307 : vector<16x16xf32>
    %310 = arith.maximumf %307, %309 : vector<16x16xf32>
    %c0_80 = arith.constant 0 : index
    %c3_81 = arith.constant 3 : index
    %311 = memref.load %arg9[%c0_80, %c3_81] : memref<1x4xf32, #tpu.memory_space<smem>>
    %312 = vector.broadcast %311 : f32 to vector<16x16xf32>
    %313 = arith.mulf %312, %310 : vector<16x16xf32>
    %314 = arith.addf %302, %313 : vector<16x16xf32>
    %315 = arith.addf %314, %8 : vector<16x16xf32>
    %cst_82 = arith.constant dense<0xFF800000> : vector<16xf32>
    %316 = vector.multi_reduction <maximumf>, %315, %cst_82 [1] : vector<16x16xf32> to vector<16xf32>
    %317 = vector.shape_cast %316 : vector<16xf32> to vector<16x1xf32>
    %318 = vector.broadcast %317 : vector<16x1xf32> to vector<16x16xf32>
    %319 = arith.subf %315, %318 : vector<16x16xf32>
    %320 = math.exp %319 : vector<16x16xf32>
    %321 = arith.mulf %320, %9 : vector<16x16xf32>
    %cst_83 = arith.constant dense<0.000000e+00> : vector<16xf32>
    %322 = vector.multi_reduction <add>, %321, %cst_83 [1] : vector<16x16xf32> to vector<16xf32>
    %323 = vector.shape_cast %322 : vector<16xf32> to vector<16x1xf32>
    %cst_84 = arith.constant 1.000000e-30 : f32
    %324 = vector.broadcast %cst_84 : f32 to vector<16x1xf32>
    %325 = arith.maximumf %323, %324 : vector<16x1xf32>
    %326 = tpu.reciprocal %325 {approx = true} : vector<16x1xf32> -> vector<16x1xf32>
    %327 = arith.truncf %321 : vector<16x16xf32> to vector<16x16xbf16>
    %328 = arith.truncf %262 : vector<16x4xf32> to vector<16x4xbf16>
    %cst_85 = arith.constant dense<0.000000e+00> : vector<16x4xf32>
    %329 = tpu.matmul %327, %328, %cst_85 {dimension_numbers = #tpu.dot_dimension_numbers<[1], [0], [0], [1], [0, 0, 1, 1], [], []>} : vector<16x16xbf16>, vector<16x4xbf16>, vector<16x4xf32> -> vector<16x4xf32>
    %330 = vector.broadcast %326 : vector<16x1xf32> to vector<16x4xf32>
    %331 = arith.mulf %329, %330 : vector<16x4xf32>
    %c0_86 = arith.constant 0 : index
    %c0_87 = arith.constant 0 : index
    %332 = vector.load %arg10[%c0_86, %c0_87] : memref<16x4xf32, #tpu.memory_space<vmem>>, vector<16x4xf32>
    tpu.vector_store %arg10[%c0_86, %c0_87], %331 {strides = array<i32>} : memref<16x4xf32, #tpu.memory_space<vmem>>, vector<16x4xf32>,
    return
  }
}

</mosaic_0001>

<bundles_post_ra>
// kernel: gatv2_forward.1
= control target key start
LH: loop header
LB: loop body
LE: loop exit
PB: predicated region body
PF: predicated region fallthrough
CT: control target
= control target key end

     0   :  { %15 = vsyncpa [#allocation3], 0  ;;  %s1575_s0 = inlined_call_operand.hbm [shape: f32[16,16], index: 0, kind: input, shape index: {}]   ;;  %s1576_s1 = inlined_call_operand.vmem [shape: s8[16,16], index: 1, kind: input, shape index: {}]   ;;  %s1577_s2 = inlined_call_operand.vmem [shape: bf16[16,32], index: 2, kind: input, shape index: {}]   ;;  %s1578_s3 = inlined_call_operand.hbm [shape: f32[1,16], index: 3, kind: input, shape index: {}]   ;;  %s1579_s4 = inlined_call_operand.hbm [shape: f32[1,16], index: 4, kind: input, shape index: {}]   ;;  %s1580_s5 = inlined_call_operand.vmem [shape: f32[2,8], index: 5, kind: input, shape index: {}]   ;;  %s1581_s6 = inlined_call_operand.vmem [shape: bf16[16,8], index: 6, kind: input, shape index: {}]   ;;  %s1582_s7 = inlined_call_operand.hbm [shape: f32[1,4], index: 7, kind: input, shape index: {}]   ;;  %s1583_s8 = inlined_call_operand.hbm [shape: f32[1,4], index: 8, kind: input, shape index: {}]   ;;  %s1584_s9 = inlined_call_operand.hbm [shape: f32[1,4], index: 9, kind: input, shape index: {}]   ;;  %s1585_s10 = inlined_call_operand.vmem [shape: f32[16,4], index: 10, kind: output, shape index: {}]  }
   0x1   :  { %16 = vsyncpa [#allocation7], 0 }
   0x2   :  { %17 = vsyncpa [#allocation5], 0 }
   0x3   :  { %18 = vsyncpa [#allocation11], 0  ;;  %s42_s15 = sshll.u32 %s1578_s3, 4  ;;  %s43_s15 = int_to_ptr.hbm [resolvable:$true] %s42_s15 }
   0x4   :  { %19 = vsyncpa [#allocation4], 0  ;;  %s1185_s16 = smov [#allocation6]   ;;  %s75_s20 = sshll.u32 %s1582_s7, 4  ;;  %s76_s20 = int_to_ptr.hbm [resolvable:$true] %s75_s20 }
   0x5   :  { %s44_s17 = sshll.u32 %s1185_s16, 4  ;;  %s1186_s21 = smov [#allocation10]   ;;  %s45_s17 = int_to_ptr.vmem [resolvable:$true] %s44_s17 }
   0x6   :  { %47 = dma.hbm_to_vmem [thread:$0]  %s43_s15, 16, %s45_s17, [#allocation7]  }
   0x7   :  { %s77_s22 = sshll.u32 %s1186_s21, 4  ;;  %s24_s25 = sshll.u32 %s1575_s0, 4  ;;  %s78_s22 = int_to_ptr.vmem [resolvable:$true] %s77_s22  ;;  %s25_s25 = int_to_ptr.hbm [resolvable:$true] %s24_s25 }
   0x8   :  { %80 = dma.hbm_to_vmem [thread:$0]  %s76_s20, 16, %s78_s22, [#allocation11]  }
   0x9   :  { %s1187_s3 = smov [#allocation2]   ;;  %s53_s29 = sshll.u32 %s1579_s4, 4  ;;  %s54_s29 = int_to_ptr.hbm [resolvable:$true] %s53_s29 }
   0xa   :  { %s26_s26 = sshll.u32 %s1187_s3, 4  ;;  %s1188_s30 = smov 128   ;;  %s27_s26 = int_to_ptr.vmem [resolvable:$true] %s26_s26 }
   0xb   :  { %s1189_s7 = smov 8   ;;  %s1190_s11 = smov [#allocation8]  }
   0xc   :  { %32 = dma.hbm_to_vmem [thread:$0]  %s25_s25, 256, %s27_s26, [#allocation3], %s1188_s30, %s1188_s30, %s1189_s7  }
   0xd   :  { %s55_s12 = sshll.u32 %s1190_s11, 4  ;;  %s64_s0 = sshll.u32 %s1580_s5, 4  ;;  %s56_s12 = int_to_ptr.vmem [resolvable:$true] %s55_s12  ;;  %s65_s0 = int_to_ptr.vmem [resolvable:$true] %s64_s0 }
   0xe   :  { %58 = dma.hbm_to_vmem [thread:$0]  %s54_s29, 16, %s56_s12, [#allocation7]  }
   0xf   :  { %s86_s17 = sshll.u32 %s1583_s8, 4  ;;  %s1191_s18 = smov [#allocation9]   ;;  %s87_s17 = int_to_ptr.hbm [resolvable:$true] %s86_s17 }
  0x10   :  { %67 = dma.vmem_to_smem %s65_s0, 32, %s1191_s18, [#allocation5]  }
  0x11   :  { %s1192_s4 = smov [#allocation12]   ;;  %s97_s22 = sshll.u32 %s1584_s9, 4  ;;  %s98_s22 = int_to_ptr.hbm [resolvable:$true] %s97_s22 }
  0x12   :  { %s88_s19 = sshll.u32 %s1192_s4, 4  ;;  %s1193_s5 = smov [#allocation13]   ;;  %s89_s19 = int_to_ptr.vmem [resolvable:$true] %s88_s19 }
  0x13   :  { %91 = dma.hbm_to_vmem [thread:$0]  %s87_s17, 16, %s89_s19, [#allocation11]  }
  0x14   :  { %100 = dma.hbm_to_smem %s98_s22, 16, %s1193_s5, [#allocation4]  }
  0x15   :  { %1175 = dma.done.wait [#allocation3], 256  }
  0x16   :  { %1176 = vsyncadd [#allocation3], 4294967040 }
  0x17   :  { %1177 = dma.done.wait [#allocation7], 32  }
  0x18   :  { %1178 = vsyncadd [#allocation7], 4294967264 }
  0x19   :  { %1179 = dma.done.wait [#allocation5], 32  }
  0x1a   :  { %1180 = vsyncadd [#allocation5], 4294967264 }
  0x1b   :  { %1181 = dma.done.wait [#allocation11], 32  }
  0x1c   :  { %1182 = vsyncadd [#allocation11], 4294967264 }
  0x1d   :  { %1183 = dma.done.wait [#allocation4], 16  }
  0x1e   :  { %1184 = vsyncadd [#allocation4], 4294967280 }
  0x1f   :  { %129 = sfence }
  0x20   :  { %v918_v0 = vld [vmem:[%s1577_s2] sm:$0xff]  ;;  %v132_v2 = vld [vmem:[#allocation2 + $0x8] sm:$0xff]  ;;  %v999_v4 = vld [vmem:[#allocation8] ss:$0 sm:$0xff]  ;;  %vm152_vm0 = vcmask 130048   ;;  %s1194_s9 = smov 16  }
  0x21   :  { %v131_v1 = vld [vmem:[#allocation2] sm:$0xff]  ;;  %163 = vmatpush.bf16.msra.mxu0 %v918_v0  ;;  %179 = vrot.lane.b32.xlu0 %v999_v4, %s1194_s9  ;;  %v1195_v5 = vmov 26   ;;  %v1196_v6 = vmov 25   ;;  %v1197_v7 = vmov 24   ;;  %v1000_v11 = vld [vmem:[#allocation6] ss:$0 sm:$0xff] }
  0x22   :  { %v133_v3 = vpack.c.bf16 %v132_v2, %v131_v1  ;;  %960 = vset.pattern.permute.xlu2 %v1195_v5  ;;  %959 = vset.pattern.permute.xlu1 %v1196_v6  ;;  %v1198_v15 = vmov 27   ;;  %v1199_v16 = vmov 28   ;;  %v1200_v18 = vmov 30   ;;  %s1355_s2 = sld [smem:[#allocation9 + $0x80]]  ;;  %v1388_v2 = vld [vmem:[%s1576_s1] sm:$0xf]  }
  0x23   :  { %958 = vset.pattern.permute.xlu0 %v1197_v7  ;;  %v1201_v19 = vmov 31   ;;  %v1202_v21 = vmov 29   ;;  %v1203_v22 = vmov 16   ;;  %v1204_v23 = vmov 19   ;;  %s1357_s24 = sld [smem:[#allocation9 + $0x81]]  ;;  %s1212_s18 = smov 120  }
  0x24   :  { %889 = vmatmul.msk.bf16.vlgmr.msra.gmra.mxu0 %vm152_vm0, %v133_v3  ;;  %v1205_v24 = vmov 21   ;;  %v1206_v25 = vmov 17   ;;  %v1207_v26 = vmov 18   ;;  %v1208_v27 = vmov 22   ;;  %s1359_s25 = sld [smem:[#allocation9 + $0x82]]  ;;  %s1213_s20 = smov 4  }
  0x25   :  { %v1209_v28 = vmov 23   ;;  %v1210_v30 = vmov 20   ;;  %s1361_s3 = sld [smem:[#allocation9 + $0x83]]  ;;  %vm655_vm3 = vcmask 64512   ;;  %vm873_vm6 = vcmask 31744  }
  0x26   :  { %s1363_s26 = sld [smem:[#allocation9 + $0x84]] }
  0x27   :  { %s1365_s27 = sld [smem:[#allocation9 + $0x85]] }
  0x28   :  { %s1367_s28 = sld [smem:[#allocation9 + $0x86]]  ;;  %v447_v60 = vstv %s1355_s2 }
  0x29   :  { %s1373_s29 = sld [smem:[#allocation9 + $0x87]]  ;;  %v466_v61 = vstv %s1357_s24 }
  0x2a   :  { %v487_v0 = vstv %s1359_s25  ;;  %s1445_s1 = sld [smem:[#allocation9]] }
  0x2b   :  { %v508_v1 = vstv %s1361_s3  ;;  %s1452_s12 = sld [smem:[#allocation9 + $0x1]] }
  0x2c   :  { %s1478_s13 = sld [smem:[#allocation9 + $0x2]] }
  0x2d   :  { %s1484_s14 = sld [smem:[#allocation9 + $0x3]] }
  0x2e   :  { %s1498_s0 = sld [smem:[#allocation9 + $0x4]] }
  0x2f   :  { %s1504_s15 = sld [smem:[#allocation9 + $0x5]] }
  0x30   :  { %s1509_s16 = sld [smem:[#allocation9 + $0x6]] }
  0x31   :  { %s1511_s17 = sld [smem:[#allocation9 + $0x7]] }
  0x32   :  { %s1552_s21 = sld [smem:[#allocation13 + $0x2]] }
  0x33   :  { %s1555_s22 = sld [smem:[#allocation13 + $0x3]] }
  0x93   :  { %v180_v8 = vpop.permute.xlu0 %179 }
  0xa1   :  { %v1299_v9 = vpop.f32.mrf.mxu0 }
  0xa2   :  { %v1302_v10 = vadd.f32 %v180_v8, %v1299_v9  ;;  %v174_v13 = vadd.f32 %v1000_v11, %v1299_v9 }
  0xa4   :  { %472 = vperm.xlu2 %960, %v1302_v10   ;;  %451 = vperm.xlu1 %959, %v1302_v10  }
  0xa5   :  { %432 = vperm.xlu0 %958, %v1302_v10  }
  0xa9   :  { %v167_v12 = vpop.f32.mrf.mxu0 }
  0xaa   :  { %v175_v14 = vadd.f32 %v1000_v11, %v167_v12  ;;  %v183_v20 = vadd.f32 %v180_v8, %v167_v12 }
  0xac   :  { %961 = vset.pattern.permute.xlu2 %v1198_v15  ;;  %962 = vset.pattern.permute.xlu1 %v1199_v16  ;;  %v1308_v17 = vpack.c.bf16 %v175_v14, %v174_v13  ;;  %v571_v14 = vstv %s1367_s28 }
  0xad   :  { %964 = vset.pattern.permute.xlu0 %v1200_v18  ;;  %493 = vperm.xlu2 %961, %v1302_v10  }
  0xae   :  { %514 = vperm.xlu1 %962, %v1302_v10   ;;  %556 = vperm.xlu0 %964, %v1302_v10  }
  0xaf   :  { %422 = vmatpush.bf16.msra.mxu1 %v1308_v17 }
  0xb5   :  { %965 = vset.pattern.permute.xlu2 %v1201_v19 }
  0xb6   :  { %963 = vset.pattern.permute.xlu1 %v1202_v21  ;;  %969 = vset.pattern.permute.xlu0 %v1198_v15  ;;  %v922_v15 = vunpack.c.0.s8 %v1388_v2 }
  0xb7   :  { %577 = vperm.xlu2 %965, %v1302_v10   ;;  %535 = vperm.xlu1 %963, %v1302_v10  }
  0xb8   :  { %497 = vperm.xlu0 %969, %v183_v20   ;;  %vm1408_vm1 = vcmp.gt.s32.totalorder %v922_v15, 0 }
  0xbf   :  { %967 = vset.pattern.permute.xlu2 %v1196_v6  ;;  %966 = vset.pattern.permute.xlu1 %v1197_v7  ;;  %v529_v6 = vstv %s1363_s26 }
  0xc0   :  { %972 = vset.pattern.permute.xlu0 %v1203_v22  ;;  %455 = vperm.xlu2 %967, %v183_v20  }
  0xc1   :  { %218 = vperm.xlu0 %972, %v1302_v10   ;;  %436 = vperm.xlu1 %966, %v183_v20  }
  0xc8   :  { %970 = vset.pattern.permute.xlu2 %v1199_v16 }
  0xc9   :  { %975 = vset.pattern.permute.xlu0 %v1204_v23  ;;  %968 = vset.pattern.permute.xlu1 %v1195_v5 }
  0xca   :  { %280 = vperm.xlu0 %975, %v1302_v10   ;;  %518 = vperm.xlu2 %970, %v183_v20  }
  0xcb   :  { %476 = vperm.xlu1 %968, %v183_v20  }
  0xd2   :  { %977 = vset.pattern.permute.xlu0 %v1205_v24  ;;  %971 = vset.pattern.permute.xlu2 %v1202_v21 }
  0xd3   :  { %973 = vset.pattern.permute.xlu1 %v1206_v25  ;;  %322 = vperm.xlu0 %977, %v1302_v10  }
  0xd4   :  { %539 = vperm.xlu2 %971, %v183_v20   ;;  %238 = vperm.xlu1 %973, %v1302_v10  }
  0xdb   :  { %983 = vset.pattern.permute.xlu0 %v1206_v25 }
  0xdc   :  { %974 = vset.pattern.permute.xlu1 %v1207_v26  ;;  %242 = vperm.xlu0 %983, %v183_v20  }
  0xdd   :  { %259 = vperm.xlu1 %974, %v1302_v10  }
  0xe4   :  { %988 = vset.pattern.permute.xlu0 %v1208_v27 }
  0xe5   :  { %978 = vset.pattern.permute.xlu1 %v1208_v27  ;;  %347 = vperm.xlu0 %988, %v183_v20  }
  0xe6   :  { %343 = vperm.xlu1 %978, %v1302_v10  }
  0xee   :  { %979 = vset.pattern.permute.xlu1 %v1209_v28 }
  0xef   :  { %364 = vperm.xlu1 %979, %v1302_v10  }
  0xf7   :  { %980 = vset.pattern.permute.xlu1 %v1200_v18 }
  0xf8   :  { %560 = vperm.xlu1 %980, %v183_v20  }
  0xfa   :  { %184 = vxpose.xlu2.b32.start [1/2] (short) (narrow) %v1299_v9, 16 }
  0xfe   :  { %v473_v36 = vpop.permute.xlu2 %472 }
 0x100   :  { %981 = vset.pattern.permute.xlu1 %v1201_v19 }
 0x101   :  { %581 = vperm.xlu1 %981, %v183_v20  }
 0x102   :  { %185 = vxpose.xlu2.b32.end [2/2] (short) (narrow) %v167_v12, 16 }
 0x107   :  { %v494_v38 = vpop.permute.xlu2 %493 }
 0x109   :  { %982 = vset.pattern.permute.xlu1 %v1203_v22 }
 0x10a   :  { %223 = vperm.xlu1 %982, %v183_v20  }
 0x111   :  { %v1333_v40 = vpop.permute.xlu2 %577 }
 0x112   :  { %984 = vset.pattern.permute.xlu1 %v1207_v26 }
 0x113   :  { %263 = vperm.xlu1 %984, %v183_v20  }
 0x116   :  { %v452_v29 = vpop.permute.xlu1 %451 }
 0x117   :  { %v433_v42 = vpop.permute.xlu0 %432 }
 0x11a   :  { %v456_v43 = vpop.permute.xlu2 %455 }
 0x11b   :  { %985 = vset.pattern.permute.xlu1 %v1204_v23  ;;  %v592_v23 = vstv %s1373_s29 }
 0x11c   :  { %284 = vperm.xlu1 %985, %v183_v20  }
 0x120   :  { %v515_v31 = vpop.permute.xlu1 %514  ;;  %v1339_v45 = vpop.permute.xlu0 %556 }
 0x124   :  { %986 = vset.pattern.permute.xlu1 %v1210_v30  ;;  %v1341_v46 = vpop.permute.xlu2 %518 }
 0x125   :  { %305 = vperm.xlu1 %986, %v183_v20  }
 0x129   :  { %v536_v32 = vpop.permute.xlu1 %535 }
 0x12a   :  { %v1345_v48 = vpop.permute.xlu0 %497 }
 0x12d   :  { %987 = vset.pattern.permute.xlu1 %v1205_v24 }
 0x12e   :  { %326 = vperm.xlu1 %987, %v183_v20   ;;  %v1347_v49 = vpop.permute.xlu2 %539 }
 0x133   :  { %v437_v33 = vpop.permute.xlu1 %436  ;;  %v1351_v51 = vpop.permute.xlu0 %218 }
 0x136   :  { %989 = vset.pattern.permute.xlu1 %v1209_v28 }
 0x137   :  { %368 = vperm.xlu1 %989, %v183_v20  }
 0x13c   :  { %v1375_v55 = vpop.permute.xlu0 %280 }
 0x13d   :  { %v1324_v34 = vpop.permute.xlu1 %476 }
 0x146   :  { %v1326_v35 = vpop.permute.xlu1 %238 }
 0x14f   :  { %v1328_v37 = vpop.permute.xlu1 %259 }
 0x158   :  { %v1330_v39 = vpop.permute.xlu1 %343 }
 0x161   :  { %v1335_v41 = vpop.permute.xlu1 %364 }
 0x164   :  { %976 = vset.pattern.permute.xlu2 %v1210_v30 }
 0x16a   :  { %v1337_v44 = vpop.permute.xlu1 %560 }
 0x16b   :  { %301 = vperm.xlu2 %976, %v1302_v10   ;;  %v550_v10 = vstv %s1365_s27 }
 0x173   :  { %v1343_v47 = vpop.permute.xlu1 %581 }
 0x17c   :  { %v1349_v50 = vpop.permute.xlu1 %223 }
 0x185   :  { %v1371_v54 = vpop.permute.xlu1 %263 }
 0x18e   :  { %v1401_v28 = vpop.permute.xlu1 %284 }
 0x193   :  { %v1353_v52 = vpop.trf.xlu2 }
 0x19b   :  { %v1369_v53 = vpop.trf.xlu2 }
 0x19c   :  { %v439_v56 = vperm.slane %v1369_v53, 0  ;;  %v458_v57 = vperm.slane %v1369_v53, 1  ;;  %v479_v58 = vperm.slane %v1369_v53, 2  ;;  %v500_v59 = vperm.slane %v1369_v53, 3 }
 0x19d   :  { %v521_v5 = vperm.slane %v1369_v53, 4  ;;  %v542_v9 = vperm.slane %v1369_v53, 5 }
 0x19e   :  { %v440_v62 = vadd.f32 %v439_v56, %v433_v42  ;;  %v459_v63 = vadd.f32 %v458_v57, %v452_v29  ;;  %v480_v3 = vadd.f32 %v479_v58, %v473_v36  ;;  %v501_v4 = vadd.f32 %v500_v59, %v494_v38  ;;  %v1404_v36 = vpop.permute.xlu0 %322 }
 0x19f   :  { %v522_v13 = vadd.f32 %v521_v5, %v515_v31  ;;  %v543_v19 = vadd.f32 %v542_v9, %v536_v32  ;;  %v441_v20 = vadd.f32 %v439_v56, %v437_v33  ;;  %v460_v29 = vadd.f32 %v458_v57, %v456_v43 }
 0x1a0   :  { %v442_v7 = vmul.f32 0.2, %v440_v62  ;;  %v461_v8 = vmul.f32 0.2, %v459_v63  ;;  %v482_v11 = vmul.f32 0.2, %v480_v3 }
 0x1a1   :  { %v503_v12 = vmul.f32 0.2, %v501_v4  ;;  %v524_v22 = vmul.f32 0.2, %v522_v13  ;;  %v545_v27 = vmul.f32 0.2, %v543_v19 }
 0x1a2   :  { %v444_v16 = vmax.f32 %v440_v62, %v442_v7  ;;  %v463_v18 = vmax.f32 %v459_v63, %v461_v8  ;;  %v484_v21 = vmax.f32 %v480_v3, %v482_v11  ;;  %v563_v31 = vperm.slane %v1369_v53, 6 }
 0x1a3   :  { %v505_v26 = vmax.f32 %v501_v4, %v503_v12  ;;  %v526_v30 = vmax.f32 %v522_v13, %v524_v22  ;;  %v584_v42 = vperm.slane %v1369_v53, 7  ;;  %v226_v56 = vperm.slane %v1353_v52, 0 }
 0x1a4   :  { %v448_v24 = vmul.f32 %v447_v60, %v444_v16  ;;  %v467_v25 = vmul.f32 %v466_v61, %v463_v18  ;;  %v488_v38 = vmul.f32 %v487_v0, %v484_v21  ;;  %v547_v43 = vmax.f32 %v543_v19, %v545_v27 }
 0x1a5   :  { %v564_v57 = vadd.f32 %v563_v31, %v1339_v45  ;;  %v443_v62 = vmul.f32 0.2, %v441_v20  ;;  %v245_v63 = vperm.slane %v1353_v52, 1  ;;  %v509_v4 = vmul.f32 %v508_v1, %v505_v26 }
 0x1a6   :  { %v469_v33 = vadd.f32 %v467_v25, %v448_v24  ;;  %v585_v7 = vadd.f32 %v584_v42, %v1333_v40  ;;  %v530_v8 = vmul.f32 %v529_v6, %v526_v30  ;;  %v462_v13 = vmul.f32 0.2, %v460_v29 }
 0x1a7   :  { %v566_v11 = vmul.f32 0.2, %v564_v57  ;;  %v445_v12 = vmax.f32 %v441_v20, %v443_v62  ;;  %v481_v19 = vadd.f32 %v479_v58, %v1324_v34  ;;  %v502_v45 = vadd.f32 %v500_v59, %v1345_v48 }
 0x1a8   :  { %v490_v3 = vadd.f32 %v488_v38, %v469_v33  ;;  %v587_v18 = vmul.f32 0.2, %v585_v7  ;;  %v551_v21 = vmul.f32 %v550_v10, %v547_v43  ;;  %v464_v25 = vmax.f32 %v460_v29, %v462_v13 }
 0x1a9   :  { %v568_v22 = vmax.f32 %v564_v57, %v566_v11  ;;  %v449_v24 = vmul.f32 %v447_v60, %v445_v12  ;;  %v483_v27 = vmul.f32 0.2, %v481_v19  ;;  %v504_v30 = vmul.f32 0.2, %v502_v45  ;;  %v1440_v57 = vpop.permute.xlu1 %305 }
 0x1aa   :  { %v511_v16 = vadd.f32 %v509_v4, %v490_v3  ;;  %v589_v40 = vmax.f32 %v585_v7, %v587_v18  ;;  %v266_v20 = vperm.slane %v1353_v52, 2  ;;  %v1211_v33 = vmov -1e+30  }
 0x1ab   :  { %v1430_v38 = vsel %vm1408_vm1, 0.0, %v1211_v33  ;;  %v468_v34 = vmul.f32 %v466_v61, %v464_v25  ;;  %v523_v48 = vadd.f32 %v521_v5, %v1341_v46  ;;  %v572_v59 = vmul.f32 %v571_v14, %v568_v22  ;;  %v243_v61 = vpop.permute.xlu0 %242 }
 0x1ac   :  { %v532_v26 = vadd.f32 %v530_v8, %v511_v16  ;;  %v485_v60 = vmax.f32 %v481_v19, %v483_v27  ;;  %v506_v29 = vmax.f32 %v502_v45, %v504_v30  ;;  %v1438_v43 = vadd.f32 %v226_v56, %v1349_v50 }
 0x1ad   :  { %v470_v62 = vadd.f32 %v468_v34, %v449_v24  ;;  %v525_v32 = vmul.f32 0.2, %v523_v48  ;;  %v544_v3 = vadd.f32 %v542_v9, %v1347_v49  ;;  %v593_v5 = vmul.f32 %v592_v23, %v589_v40 }
 0x1ae   :  { %v553_v58 = vadd.f32 %v551_v21, %v532_v26  ;;  %v489_v4 = vmul.f32 %v487_v0, %v485_v60  ;;  %v565_v50 = vadd.f32 %v563_v31, %v1337_v44  ;;  %v247_v7 = vadd.f32 %v245_v63, %v243_v61 }
 0x1af   :  { %v527_v8 = vmax.f32 %v523_v48, %v525_v32  ;;  %v546_v11 = vmul.f32 0.2, %v544_v3  ;;  %v586_v12 = vadd.f32 %v584_v42, %v1343_v47  ;;  %v510_v9 = vmul.f32 %v508_v1, %v506_v29 }
 0x1b0   :  { %v574_v46 = vadd.f32 %v572_v59, %v553_v58  ;;  %v491_v49 = vadd.f32 %v489_v4, %v470_v62  ;;  %v567_v13 = vmul.f32 0.2, %v565_v50  ;;  %v923_v16 = vunpack.c.1.s8 %v1388_v2 }
 0x1b1   :  { %v548_v18 = vmax.f32 %v544_v3, %v546_v11  ;;  %v588_v0 = vmul.f32 0.2, %v586_v12  ;;  %v227_v44 = vadd.f32 %v226_v56, %v1351_v51  ;;  %v531_v45 = vmul.f32 %v529_v6, %v527_v8 }
 0x1b2   :  { %v595_v53 = vadd.f32 %v593_v5, %v574_v46  ;;  %v512_v19 = vadd.f32 %v510_v9, %v491_v49  ;;  %v569_v47 = vmax.f32 %v565_v50, %v567_v13  ;;  %v230_v42 = vmul.f32 0.2, %v1438_v43 }
 0x1b3   :  { %v249_v1 = vmul.f32 0.2, %v247_v7  ;;  %v246_v21 = vadd.f32 %v245_v63, %v1326_v35  ;;  %v552_v51 = vmul.f32 %v550_v10, %v548_v18  ;;  %v590_v56 = vmax.f32 %v586_v12, %v588_v0  ;;  %v327_v10 = vpop.permute.xlu1 %326 }
 0x1b4   :  { %v1460_v31 = vadd.f32 %v595_v53, %v1430_v38  ;;  %v533_v24 = vadd.f32 %v531_v45, %v512_v19  ;;  %v287_v25 = vperm.slane %v1353_v52, 3  ;;  %v229_v6 = vmul.f32 0.2, %v227_v44 }
 0x1b5   :  { %v248_v26 = vmul.f32 0.2, %v246_v21  ;;  %v268_v40 = vadd.f32 %v266_v20, %v1371_v54  ;;  %vm139_vm2 = vcmp.gt.s32.totalorder %v923_v16, 0  ;;  %v573_v35 = vmul.f32 %v571_v14, %v569_v47 }
 0x1b6   :  { %v599_v22 = vsel %vm152_vm0, %v1460_v31, -inf  ;;  %v554_v27 = vadd.f32 %v552_v51, %v533_v24  ;;  %v234_v63 = vstv %s1445_s1  ;;  %v253_v30 = vstv %s1452_s12 }
 0x1b7   :  { %600 = vmax.xlane.f32.xlu0 %v599_v22  ;;  %v267_v34 = vadd.f32 %v266_v20, %v1328_v37  ;;  %v232_v48 = vmax.f32 %v1438_v43, %v230_v42  ;;  %v251_v58 = vmax.f32 %v247_v7, %v249_v1  ;;  %v594_v60 = vmul.f32 %v592_v23, %v590_v56  ;;  %v348_v56 = vpop.permute.xlu0 %347 }
 0x1b8   :  { %v575_v59 = vadd.f32 %v573_v35, %v554_v27  ;;  %v329_v54 = vperm.slane %v1353_v52, 5  ;;  %v1487_v29 = vsel %vm139_vm2, 0.0, %v1211_v33  ;;  %v231_v14 = vmax.f32 %v227_v44, %v229_v6 }
 0x1b9   :  { %v250_v62 = vmax.f32 %v246_v21, %v248_v26  ;;  %v270_v32 = vmul.f32 0.2, %v268_v40  ;;  %v289_v3 = vadd.f32 %v287_v25, %v1401_v28  ;;  %v308_v37 = vperm.slane %v1353_v52, 4 }
 0x1ba   :  { %v596_v61 = vadd.f32 %v594_v60, %v575_v59  ;;  %v288_v20 = vadd.f32 %v287_v25, %v1375_v55  ;;  %v269_v43 = vmul.f32 0.2, %v267_v34  ;;  %v236_v46 = vmul.f32 %v234_v63, %v232_v48 }
 0x1bb   :  { %v255_v23 = vmul.f32 %v253_v30, %v251_v58  ;;  %v371_v5 = vperm.slane %v1353_v52, 7  ;;  %v330_v33 = vadd.f32 %v329_v54, %v1404_v36  ;;  %v235_v50 = vmul.f32 %v234_v63, %v231_v14  ;;  %v369_v0 = vpop.permute.xlu1 %368 }
 0x1bc   :  { %v1494_v4 = vadd.f32 %v596_v61, %v1487_v29  ;;  %v254_v7 = vmul.f32 %v253_v30, %v250_v62  ;;  %v350_v28 = vperm.slane %v1353_v52, 6  ;;  %v272_v8 = vmax.f32 %v268_v40, %v270_v32 }
 0x1bd   :  { %v291_v11 = vmul.f32 0.2, %v289_v3  ;;  %v310_v55 = vadd.f32 %v308_v37, %v1440_v57  ;;  %v274_v53 = vstv %s1478_s13  ;;  %v331_v49 = vadd.f32 %v329_v54, %v327_v10 }
 0x1be   :  { %v602_v12 = vsel %vm152_vm0, %v1494_v4, -inf  ;;  %v290_v9 = vmul.f32 0.2, %v288_v20  ;;  %v271_v13 = vmax.f32 %v267_v34, %v269_v43  ;;  %v257_v36 = vadd.f32 %v255_v23, %v236_v46 }
 0x1bf   :  { %603 = vmax.xlane.f32.xlu1 %v602_v12  ;;  %v295_v18 = vstv %s1484_s14  ;;  %v372_v52 = vadd.f32 %v371_v5, %v1335_v41  ;;  %v256_v44 = vadd.f32 %v254_v7, %v235_v50  ;;  %v351_v19 = vadd.f32 %v350_v28, %v1330_v39 }
 0x1c0   :  { %v276_v45 = vmul.f32 %v274_v53, %v272_v8  ;;  %v293_v57 = vmax.f32 %v289_v3, %v291_v11  ;;  %v312_v47 = vmul.f32 0.2, %v310_v55  ;;  %v332_v42 = vmul.f32 0.2, %v330_v33 }
 0x1c1   :  { %v333_v21 = vmul.f32 0.2, %v331_v49  ;;  %v292_v22 = vmax.f32 %v288_v20, %v290_v9  ;;  %v275_v24 = vmul.f32 %v274_v53, %v271_v13  ;;  %v373_v41 = vadd.f32 %v371_v5, %v369_v0 }
 0x1c2   :  { %v278_v25 = vadd.f32 %v276_v45, %v257_v36  ;;  %v353_v26 = vmul.f32 0.2, %v351_v19  ;;  %v352_v40 = vadd.f32 %v350_v28, %v348_v56  ;;  %v297_v27 = vmul.f32 %v295_v18, %v293_v57 }
 0x1c3   :  { %v277_v6 = vadd.f32 %v275_v24, %v256_v44  ;;  %v316_v35 = vstv %s1498_s0  ;;  %v314_v63 = vmax.f32 %v310_v55, %v312_v47  ;;  %v374_v30 = vmul.f32 0.2, %v372_v52 }
 0x1c4   :  { %v334_v10 = vmax.f32 %v330_v33, %v332_v42  ;;  %v335_v34 = vmax.f32 %v331_v49, %v333_v21  ;;  %v296_v48 = vmul.f32 %v295_v18, %v292_v22  ;;  %v299_v59 = vadd.f32 %v297_v27, %v278_v25 }
 0x1c5   :  { %v302_v1 = vpop.permute.xlu2 %301  ;;  %v337_v60 = vstv %s1504_s15  ;;  %v375_v54 = vmul.f32 0.2, %v373_v41  ;;  %v355_v32 = vmax.f32 %v351_v19, %v353_v26  ;;  %v354_v3 = vmul.f32 0.2, %v352_v40 }
 0x1c6   :  { %v309_v51 = vadd.f32 %v308_v37, %v302_v1  ;;  %v298_v14 = vadd.f32 %v296_v48, %v277_v6  ;;  %v318_v61 = vmul.f32 %v316_v35, %v314_v63  ;;  %v358_v37 = vstv %s1509_s16 }
 0x1c7   :  { %v338_v20 = vmul.f32 %v337_v60, %v334_v10  ;;  %v339_v43 = vmul.f32 %v337_v60, %v335_v34  ;;  %v376_v46 = vmax.f32 %v372_v52, %v374_v30  ;;  %v379_v33 = vstv %s1511_s17 }
 0x1c8   :  { %v311_v39 = vmul.f32 0.2, %v309_v51  ;;  %v320_v5 = vadd.f32 %v318_v61, %v299_v59  ;;  %v377_v50 = vmax.f32 %v373_v41, %v375_v54  ;;  %v359_v28 = vmul.f32 %v358_v37, %v355_v32 }
 0x1c9   :  { %v356_v8 = vmax.f32 %v352_v40, %v354_v3  ;;  %v380_v12 = vmul.f32 %v379_v33, %v376_v46  ;;  %v1525_v57 = vcvt.s32.f32 %v922_v15 }
 0x1ca   :  { %v313_v58 = vmax.f32 %v309_v51, %v311_v39  ;;  %v341_v11 = vadd.f32 %v339_v43, %v320_v5  ;;  %v381_v53 = vmul.f32 %v379_v33, %v377_v50  ;;  %v919_v43 = vld [vmem:[%s1581_s6] sm:$0xff]  ;;  %v1001_v5 = vld [vmem:[#allocation12] ss:$0 sm:$0xff]  ;;  %s1548_s6 = sld [smem:[#allocation13]] }
 0x1cb   :  { %625 = vrot.lane.b32.xlu0 %v1308_v17, %s1212_s18  ;;  %v360_v17 = vmul.f32 %v358_v37, %v356_v8  ;;  %689 = vmatpush.bf16.msra.mxu3 %v919_v43 }
 0x1cc   :  { %v317_v62 = vmul.f32 %v316_v35, %v313_v58 }
 0x1cd   :  { %v362_v13 = vadd.f32 %v360_v17, %v341_v11 }
 0x1ce   :  { %v319_v23 = vadd.f32 %v317_v62, %v298_v14 }
 0x1cf   :  { %v383_v18 = vadd.f32 %v381_v53, %v362_v13 }
 0x1d0   :  { %v340_v7 = vadd.f32 %v338_v20, %v319_v23 }
 0x1d1   :  { %v385_v52 = vadd.f32 %v383_v18, %v1487_v29 }
 0x1d2   :  { %v361_v55 = vadd.f32 %v359_v28, %v340_v7 }
 0x1d3   :  { %v389_v0 = vsel %vm152_vm0, %v385_v52, -inf }
 0x1d4   :  { %v382_v49 = vadd.f32 %v380_v12, %v361_v55 }
 0x1d6   :  { %v384_v9 = vadd.f32 %v382_v49, %v1430_v38 }
 0x1d8   :  { %v386_v36 = vsel %vm152_vm0, %v384_v9, -inf }
 0x1d9   :  { %387 = vmax.xlane.f32.xlu1 %v386_v36 }
 0x1e1   :  { %390 = vmax.xlane.f32.xlu1 %v389_v0 }
 0x22a   :  { %v601_v44 = vpop.xlane.xlu0 %600 }
 0x22b   :  { %v605_v19 = vsub.f32 %v1460_v31, %v601_v44  ;;  %v1532_v31 = vcvt.s32.f32 %v923_v16 }
 0x22d   :  { %v607_v45 = vmul.f32 1.442695, %v605_v19 }
 0x22f   :  { %1003 = vpow2.f32 %v607_v45 }
 0x232   :  { %v604_v47 = vpop.xlane.xlu1 %603 }
 0x233   :  { %v606_v1 = vsub.f32 %v1494_v4, %v604_v47 }
 0x235   :  { %v1004_v42 = vpop.eup %1003  ;;  %v609_v22 = vmul.f32 1.442695, %v606_v1  ;;  %v1215_v1 = vmov 4  }
 0x236   :  { %v611_v21 = vmul.f32 %v1004_v42, %v1525_v57  ;;  %v1214_v42 = vmov 6   ;;  %990 = vset.pattern.permute.xlu2 %v1215_v1 }
 0x237   :  { %1005 = vpow2.f32 %v609_v22  ;;  %992 = vset.pattern.permute.xlu0 %v1214_v42 }
 0x238   :  { %v613_v24 = vsel %vm152_vm0, %v611_v21, 0.0 }
 0x239   :  { %614 = vadd.xlane.f32.xlu1 %v613_v24 }
 0x23d   :  { %v626_v51 = vpop.permute.xlu0 %625  ;;  %v1006_v56 = vpop.eup %1005 }
 0x23e   :  { %638 = vmatpush.bf16.msra.mxu2 %v626_v51  ;;  %v612_v15 = vmul.f32 %v1006_v56, %v1532_v31  ;;  %v1002_v56 = vld [vmem:[#allocation10] ss:$0 sm:$0xff] }
 0x240   :  { %v616_v25 = vsel %vm152_vm0, %v612_v15, 0.0  ;;  %v623_v41 = vpack.c.bf16 %v612_v15, %v611_v21  ;;  %v1216_v21 = vmov 5  }
 0x241   :  { %617 = vadd.xlane.f32.xlu0 %v616_v25  ;;  %991 = vset.pattern.permute.xlu1 %v1216_v21 }
 0x242   :  { %906 = vmatmul.msk.bf16.vlgmr.msra.gmra.mxu2 %vm152_vm0, %v623_v41 }
 0x24c   :  { %v388_v4 = vpop.xlane.xlu1 %387 }
 0x24d   :  { %v392_v6 = vsub.f32 %v384_v9, %v388_v4 }
 0x24f   :  { %v394_v39 = vmul.f32 1.442695, %v392_v6  ;;  %v1217_v6 = vmov 7  }
 0x251   :  { %1007 = vpow2.f32 %v394_v39 }
 0x254   :  { %v391_v26 = vpop.xlane.xlu1 %390 }
 0x255   :  { %v393_v40 = vsub.f32 %v385_v52, %v391_v26  ;;  %705 = vrot.lane.b32.xlu0 %v1001_v5, %s1213_s20 }
 0x257   :  { %v1008_v2 = vpop.eup %1007  ;;  %v396_v16 = vmul.f32 1.442695, %v393_v40 }
 0x258   :  { %v398_v27 = vmul.f32 %v1008_v2, %v1525_v57 }
 0x259   :  { %1009 = vpow2.f32 %v396_v16 }
 0x25a   :  { %v400_v35 = vsel %vm152_vm0, %v398_v27, 0.0 }
 0x25b   :  { %401 = vadd.xlane.f32.xlu2 %v400_v35 }
 0x25f   :  { %v1010_v63 = vpop.eup %1009 }
 0x260   :  { %v399_v30 = vmul.f32 %v1010_v63, %v1532_v31 }
 0x262   :  { %v403_v10 = vsel %vm152_vm0, %v399_v30, 0.0  ;;  %v410_v34 = vpack.c.bf16 %v399_v30, %v398_v27 }
 0x263   :  { %404 = vadd.xlane.f32.xlu1 %v403_v10 }
 0x264   :  { %897 = vmatmul.msk.bf16.vlgmr.msra.gmra.mxu1 %vm152_vm0, %v410_v34 }
 0x2ac   :  { %v615_v48 = vpop.xlane.xlu1 %614 }
 0x2ad   :  { %v619_v58 = vmax.f32 %v615_v48, 1e-30 }
 0x2af   :  { %1011 = vrcp.f32 %v619_v58  ;;  %v760_v58 = vstv %s1548_s6 }
 0x2b4   :  { %v618_v59 = vpop.xlane.xlu0 %617 }
 0x2b5   :  { %v620_v60 = vmax.f32 %v618_v59, 1e-30  ;;  %v1012_v54 = vpop.eup %1011 }
 0x2b7   :  { %1013 = vrcp.f32 %v620_v60 }
 0x2bd   :  { %v1014_v32 = vpop.eup %1013 }
 0x2c5   :  { %v640_v14 = vpop.f32.mrf.mxu2 }
 0x2c6   :  { %v645_v62 = vmul.f32 %v1012_v54, %v640_v14 }
 0x2c7   :  { %v706_v22 = vpop.permute.xlu0 %705 }
 0x2c8   :  { %649 = vrot.lane.b32.xlu1 %v645_v62, %s1189_s7 }
 0x2cd   :  { %v642_v3 = vpop.f32.mrf.mxu2 }
 0x2ce   :  { %v646_v61 = vmul.f32 %v1014_v32, %v642_v3  ;;  %v402_v37 = vpop.xlane.xlu2 %401 }
 0x2cf   :  { %v406_v20 = vmax.f32 %v402_v37, 1e-30 }
 0x2d0   :  { %651 = vrot.lane.b32.xlu1 %v646_v61, %s1189_s7  ;;  %s1550_s7 = sld [smem:[#allocation13 + $0x1]] }
 0x2d1   :  { %1015 = vrcp.f32 %v406_v20 }
 0x2d6   :  { %v405_v46 = vpop.xlane.xlu1 %404  ;;  %v779_v43 = vstv %s1550_s7 }
 0x2d7   :  { %v407_v33 = vmax.f32 %v405_v46, 1e-30  ;;  %v1016_v50 = vpop.eup %1015 }
 0x2d9   :  { %1017 = vrcp.f32 %v407_v33 }
 0x2df   :  { %v1018_v12 = vpop.eup %1017 }
 0x2e1   :  { %v424_v23 = vpop.f32.mrf.mxu1 }
 0x2e2   :  { %v429_v7 = vmul.f32 %v1016_v50, %v424_v23 }
 0x2e9   :  { %v426_v55 = vpop.f32.mrf.mxu1 }
 0x2ea   :  { %v430_v49 = vmul.f32 %v1018_v12, %v426_v55 }
 0x33a   :  { %v650_v28 = vpop.permute.xlu1 %649 }
 0x33b   :  { %v656_v8 = vsel %vm655_vm3, %v429_v7, %v650_v28  ;;  %v800_v28 = vstv %s1552_s21 }
 0x33c   :  { %v660_v11 = vmin.f32 %v656_v8, 0.0  ;;  %vm658_vm4 = vcmp.gt.f32.partialorder %v656_v8, 0.0 }
 0x33e   :  { %v662_v53 = vmul.f32 1.442695, %v660_v11 }
 0x340   :  { %1019 = vpow2.f32 %v662_v53 }
 0x342   :  { %v652_v17 = vpop.permute.xlu1 %651 }
 0x343   :  { %v657_v9 = vsel %vm655_vm3, %v430_v49, %v652_v17 }
 0x344   :  { %v661_v13 = vmin.f32 %v657_v9, 0.0  ;;  %vm659_vm5 = vcmp.gt.f32.partialorder %v657_v9, 0.0 }
 0x346   :  { %v664_v36 = vmul.f32 1.442695, %v661_v13  ;;  %v1020_v18 = vpop.eup %1019 }
 0x347   :  { %v907_v52 = vadd.f32 -1.0, %v1020_v18 }
 0x348   :  { %1021 = vpow2.f32 %v664_v36 }
 0x349   :  { %v668_v19 = vsel %vm658_vm4, %v656_v8, %v907_v52 }
 0x34e   :  { %v1022_v0 = vpop.eup %1021 }
 0x34f   :  { %v908_v44 = vadd.f32 -1.0, %v1022_v0 }
 0x351   :  { %v669_v45 = vsel %vm659_vm5, %v657_v9, %v908_v44 }
 0x352   :  { %v670_v47 = vpack.c.bf16 %v669_v45, %v668_v19  ;;  %v821_v19 = vstv %s1555_s22 }
 0x354   :  { %913 = vmatmul.msk.bf16.vlgmr.msra.gmra.mxu3 %vm152_vm0, %v670_v47 }
 0x3d7   :  { %v691_v24 = vpop.f32.mrf.mxu3 }
 0x3d8   :  { %v708_v51 = vadd.f32 %v706_v22, %v691_v24  ;;  %v700_v4 = vadd.f32 %v1002_v56, %v691_v24 }
 0x3da   :  { %785 = vperm.xlu0 %992, %v708_v51   ;;  %764 = vperm.xlu1 %991, %v708_v51  }
 0x3db   :  { %744 = vperm.xlu2 %990, %v708_v51  }
 0x3df   :  { %v693_v15 = vpop.f32.mrf.mxu3 }
 0x3e0   :  { %v701_v25 = vadd.f32 %v1002_v56, %v693_v15  ;;  %v709_v41 = vadd.f32 %v706_v22, %v693_v15 }
 0x3e2   :  { %993 = vset.pattern.permute.xlu1 %v1217_v6  ;;  %v853_v39 = vpack.c.bf16 %v701_v25, %v700_v4  ;;  %998 = vset.pattern.permute.xlu0 %v1217_v6 }
 0x3e3   :  { %996 = vset.pattern.permute.xlu2 %v1214_v42  ;;  %806 = vperm.xlu1 %993, %v708_v51  }
 0x3e4   :  { %789 = vperm.xlu2 %996, %v709_v41   ;;  %864 = vmatpush.bf16.msrb.mxu0 %v853_v39 }
 0x3eb   :  { %994 = vset.pattern.permute.xlu1 %v1215_v1 }
 0x3ec   :  { %997 = vset.pattern.permute.xlu2 %v1217_v6  ;;  %749 = vperm.xlu1 %994, %v709_v41  }
 0x3ed   :  { %810 = vperm.xlu2 %997, %v709_v41  }
 0x3f4   :  { %995 = vset.pattern.permute.xlu1 %v1216_v21 }
 0x3f5   :  { %768 = vperm.xlu1 %995, %v709_v41  }
 0x42a   :  { %710 = vxpose.xlu1.b32.start [1/2] (short) (narrow) %v691_v24, 8 }
 0x432   :  { %711 = vxpose.xlu1.b32.end [2/2] (short) (narrow) %v693_v15, 8 }
 0x435   :  { %v745_v16 = vpop.permute.xlu2 %744 }
 0x43e   :  { %v790_v35 = vpop.permute.xlu2 %789 }
 0x447   :  { %v811_v59 = vpop.permute.xlu2 %810 }
 0x44c   :  { %v765_v26 = vpop.permute.xlu1 %764  ;;  %v786_v60 = vpop.permute.xlu0 %785 }
 0x455   :  { %v807_v40 = vpop.permute.xlu1 %806 }
 0x45e   :  { %v750_v2 = vpop.permute.xlu1 %749 }
 0x467   :  { %v769_v27 = vpop.permute.xlu1 %768 }
 0x4ce   :  { %v726_v63 = vpop.trf.xlu1 }
 0x4cf   :  { %v752_v30 = vperm.slane %v726_v63, 0  ;;  %v771_v10 = vperm.slane %v726_v63, 1  ;;  %v792_v34 = vperm.slane %v726_v63, 2  ;;  %v813_v48 = vperm.slane %v726_v63, 3 }
 0x4d1   :  { %v753_v54 = vadd.f32 %v752_v30, %v745_v16  ;;  %v754_v14 = vadd.f32 %v752_v30, %v750_v2  ;;  %v772_v62 = vadd.f32 %v771_v10, %v765_v26  ;;  %v773_v32 = vadd.f32 %v771_v10, %v769_v27 }
 0x4d2   :  { %v793_v3 = vadd.f32 %v792_v34, %v786_v60  ;;  %v794_v61 = vadd.f32 %v792_v34, %v790_v35  ;;  %v814_v37 = vadd.f32 %v813_v48, %v807_v40  ;;  %v815_v20 = vadd.f32 %v813_v48, %v811_v59 }
 0x4d3   :  { %v755_v46 = vmul.f32 0.2, %v753_v54  ;;  %v756_v23 = vmul.f32 0.2, %v754_v14  ;;  %v774_v5 = vmul.f32 0.2, %v772_v62 }
 0x4d4   :  { %v775_v33 = vmul.f32 0.2, %v773_v32  ;;  %v795_v50 = vmul.f32 0.2, %v793_v3  ;;  %v796_v7 = vmul.f32 0.2, %v794_v61 }
 0x4d5   :  { %v757_v8 = vmax.f32 %v753_v54, %v755_v46  ;;  %v758_v11 = vmax.f32 %v754_v14, %v756_v23  ;;  %v776_v55 = vmax.f32 %v772_v62, %v774_v5  ;;  %v816_v12 = vmul.f32 0.2, %v814_v37 }
 0x4d6   :  { %v777_v53 = vmax.f32 %v773_v32, %v775_v33  ;;  %v797_v49 = vmax.f32 %v793_v3, %v795_v50  ;;  %v798_v17 = vmax.f32 %v794_v61, %v796_v7  ;;  %v817_v9 = vmul.f32 0.2, %v815_v20 }
 0x4d7   :  { %v761_v13 = vmul.f32 %v760_v58, %v757_v8  ;;  %v762_v36 = vmul.f32 %v760_v58, %v758_v11  ;;  %v780_v18 = vmul.f32 %v779_v43, %v776_v55  ;;  %v818_v52 = vmax.f32 %v814_v37, %v816_v12 }
 0x4d8   :  { %v781_v0 = vmul.f32 %v779_v43, %v777_v53  ;;  %v819_v44 = vmax.f32 %v815_v20, %v817_v9  ;;  %v801_v47 = vmul.f32 %v800_v28, %v797_v49  ;;  %v802_v1 = vmul.f32 %v800_v28, %v798_v17 }
 0x4d9   :  { %v782_v45 = vadd.f32 %v780_v18, %v761_v13  ;;  %v822_v22 = vmul.f32 %v821_v19, %v818_v52 }
 0x4da   :  { %v783_v42 = vadd.f32 %v781_v0, %v762_v36  ;;  %v823_v51 = vmul.f32 %v821_v19, %v819_v44 }
 0x4db   :  { %v803_v21 = vadd.f32 %v801_v47, %v782_v45 }
 0x4dc   :  { %v804_v24 = vadd.f32 %v802_v1, %v783_v42 }
 0x4dd   :  { %v824_v56 = vadd.f32 %v822_v22, %v803_v21 }
 0x4de   :  { %v825_v15 = vadd.f32 %v823_v51, %v804_v24 }
 0x4df   :  { %v826_v25 = vadd.f32 %v824_v56, %v1430_v38 }
 0x4e0   :  { %v827_v41 = vadd.f32 %v825_v15, %v1487_v29 }
 0x4e1   :  { %v828_v4 = vsel %vm152_vm0, %v826_v25, -inf }
 0x4e2   :  { %v831_v6 = vsel %vm152_vm0, %v827_v41, -inf  ;;  %829 = vmax.xlane.f32.xlu0 %v828_v4 }
 0x4e3   :  { %832 = vmax.xlane.f32.xlu2 %v831_v6 }
 0x555   :  { %v830_v39 = vpop.xlane.xlu0 %829 }
 0x556   :  { %v833_v26 = vpop.xlane.xlu2 %832  ;;  %v834_v40 = vsub.f32 %v826_v25, %v830_v39 }
 0x557   :  { %v835_v2 = vsub.f32 %v827_v41, %v833_v26 }
 0x558   :  { %v836_v16 = vmul.f32 1.442695, %v834_v40 }
 0x559   :  { %v838_v27 = vmul.f32 1.442695, %v835_v2 }
 0x55a   :  { %1023 = vpow2.f32 %v836_v16 }
 0x55b   :  { %1025 = vpow2.f32 %v838_v27 }
 0x560   :  { %v1024_v35 = vpop.eup %1023 }
 0x561   :  { %v1026_v63 = vpop.eup %1025  ;;  %v840_v38 = vmul.f32 %v1024_v35, %v1525_v57 }
 0x562   :  { %v841_v29 = vmul.f32 %v1026_v63, %v1532_v31 }
 0x563   :  { %v842_v30 = vsel %vm152_vm0, %v840_v38, 0.0 }
 0x564   :  { %v845_v10 = vsel %vm152_vm0, %v841_v29, 0.0  ;;  %v852_v34 = vpack.c.bf16 %v841_v29, %v840_v38  ;;  %843 = vadd.xlane.f32.xlu0 %v842_v30 }
 0x565   :  { %846 = vadd.xlane.f32.xlu2 %v845_v10 }
 0x566   :  { %917 = vmatmul.msk.bf16.vlgmr.msrb.gmra.mxu0 %vm152_vm0, %v852_v34 }
 0x5d7   :  { %v844_v48 = vpop.xlane.xlu0 %843 }
 0x5d8   :  { %v848_v58 = vmax.f32 %v844_v48, 1e-30  ;;  %v847_v59 = vpop.xlane.xlu2 %846 }
 0x5d9   :  { %v849_v60 = vmax.f32 %v847_v59, 1e-30 }
 0x5da   :  { %1027 = vrcp.f32 %v848_v58 }
 0x5db   :  { %1029 = vrcp.f32 %v849_v60 }
 0x5e0   :  { %v1028_v54 = vpop.eup %1027 }
 0x5e1   :  { %v1030_v31 = vpop.eup %1029 }
 0x5e3   :  { %v866_v14 = vpop.f32.mrf.mxu0 }
 0x5e4   :  { %v871_v57 = vmul.f32 %v1028_v54, %v866_v14 }
 0x5e6   :  { %874 = vst.msk [vmem:[%s1585_s10] sm:$0xff] %vm873_vm6, %v871_v57 }
 0x5eb   :  { %v868_v62 = vpop.f32.mrf.mxu0 }
 0x5ec   :  { %v872_v32 = vmul.f32 %v1030_v31, %v868_v62 }
 0x5ee   :  { %875 = vst.msk [vmem:[%s1585_s10 + $0x8] sm:$0xff] %vm873_vm6, %v872_v32 }
 0x5ef   :  { %880 = vsyncpa [#allocation3], 1 }
 0x5f0   :  { %881 = vsyncpa [#allocation7], 1 }
 0x5f1   :  { %882 = vsyncpa [#allocation11], 1 }
 0x5f2   :  { %883 = vsyncpa [#allocation4], 1 }
 0x5f3   :  { %884 = vsyncpa [#allocation5], 1 }

</bundles_post_ra>
